<compile_context>
chip_gen: v5e
topology: v5e:2x2
jax: 0.10.0
libtpu: 0.0.40
codegen_flags: <defaults>
</compile_context>

<pallas_src>
import functools

import jax
import jax.numpy as jnp
from jax.experimental import pallas as pl
from jax.experimental.pallas import tpu as pltpu

HIDDEN = 128
LANES = 128  # lane-dense fused-head width


def policy_kernel(x_ref, w1_ref, wh_ref, b_ref, prob_ref, val_ref, *,
                  n_actions, state_dim):
    x = x_ref[...]                       # (TB, state_dim)
    w1 = w1_ref[...]                     # (state_dim, HIDDEN)
    b1 = b_ref[0:1, :]                   # (1, HIDDEN)
    bh = b_ref[1:2, :]                   # (1, LANES)  fused head bias (zero-padded)

    # --- Layer 1 on the VPU: K = state_dim (= 4) is far too small for the MXU.
    h = x[:, 0:1] * w1[0:1, :]
    for k in range(1, state_dim):
        h = h + x[:, k:k + 1] * w1[k:k + 1, :]
    h = jnp.maximum(h + b1, 0.0)         # (TB, HIDDEN) f32

    # --- Fused actor+critic heads: one MXU matmul (bf16 operands if packed so),
    #     f32 accumulation.
    z = jnp.dot(h.astype(wh_ref.dtype), wh_ref[...],
                preferred_element_type=jnp.float32) + bh       # (TB, LANES)

    lane = jax.lax.broadcasted_iota(jnp.int32, z.shape, dimension=1)
    is_logit = lane < n_actions

    # Masked softmax over the first A lanes only; exact divide (free at this size).
    masked = jnp.where(is_logit, z, jnp.float32(-jnp.inf))
    m = jnp.max(masked, axis=-1, keepdims=True)
    e = jnp.where(is_logit, jnp.exp(masked - m), 0.0)
    denom = jnp.sum(e, axis=-1, keepdims=True)
    probs = e / denom

    prob_ref[...] = probs[:, :n_actions].astype(prob_ref.dtype)
    val_ref[...] = z[:, n_actions:n_actions + 1].astype(val_ref.dtype)


def pack_params(params, head_dtype=jnp.float32):
    """One-time parameter transform (hoisted out of the per-call hot path).

    Packs actor + critic head weights into a single lane-dense (HIDDEN, LANES)
    matrix (cols [0:A] = actor, col A = critic, rest zero) and stacks the two
    biases into one (2, LANES) array.  Call once; reuse the result every step.
    Pass head_dtype=jnp.bfloat16 to cut MXU passes ~3x at large batch.
    """
    w1, b1, wa, ba, wv, bv = params
    hid = w1.shape[1]
    A = wa.shape[1]
    assert hid == HIDDEN and A + 1 <= LANES

    wh = jnp.zeros((hid, LANES), head_dtype)
    wh = wh.at[:, :A].set(wa.astype(head_dtype))
    wh = wh.at[:, A:A + 1].set(wv.astype(head_dtype))

    bh = jnp.zeros((1, LANES), jnp.float32)
    bh = bh.at[:, :A].set(ba).at[:, A:A + 1].set(bv)
    biases = jnp.concatenate([b1, bh], axis=0)      # (2, LANES) f32

    return (w1, wh, biases, A)


def policy_forward(x, packed, *, row_block=128):
    """x: (B, state_dim) float32; packed = pack_params(params).

    Returns (action_prob (B, A), state_values (B, 1)) — same semantics as the
    PyTorch Policy.forward.
    """
    w1, wh, biases, A = packed
    B, state_dim = x.shape
    hid = w1.shape[1]

    tb = min(row_block, B)               # (tb, .) blocks: tb is a mult. of 8 or == B
    nb = pl.cdiv(B, tb)

    cost = pl.CostEstimate(
        flops=2 * B * (state_dim * hid + hid * LANES),
        transcendentals=B * LANES,
        bytes_accessed=4 * (x.size + w1.size + biases.size + B * (A + 1))
        + wh.dtype.itemsize * wh.size,
    )

    prob, val = pl.pallas_call(
        functools.partial(policy_kernel, n_actions=A, state_dim=state_dim),
        out_shape=(jax.ShapeDtypeStruct((B, A), jnp.float32),
                   jax.ShapeDtypeStruct((B, 1), jnp.float32)),
        grid=(nb,),
        in_specs=[
            pl.BlockSpec((tb, state_dim), lambda i: (i, 0)),   # x: tiled over rows
            pl.BlockSpec((state_dim, hid), lambda i: (0, 0)),  # weights: constant
            pl.BlockSpec((hid, LANES), lambda i: (0, 0)),      #   index_map -> VMEM-
            pl.BlockSpec((2, LANES), lambda i: (0, 0)),        #   resident, one DMA
        ],
        out_specs=(
            pl.BlockSpec((tb, A), lambda i: (i, 0)),
            pl.BlockSpec((tb, 1), lambda i: (i, 0)),
        ),
        compiler_params=pltpu.CompilerParams(
            dimension_semantics=("parallel",)),  # shards row tiles over v7x's 2 TCs
        cost_estimate=cost,
    )(x, w1, wh, biases)

    return prob, val


def init_params(key, state_dim=4, hidden=HIDDEN, n_actions=2):
    """Deterministic init mimicking PyTorch Linear default (uniform +/- 1/sqrt(fan_in)).
    Weights are stored transposed: (in_features, out_features)."""
    ks = jax.random.split(key, 6)

    def lin(kw, kb, fan_in, fan_out):
        bound = 1.0 / jnp.sqrt(fan_in)
        w = jax.random.uniform(kw, (fan_in, fan_out), jnp.float32, -bound, bound)
        b = jax.random.uniform(kb, (1, fan_out), jnp.float32, -bound, bound)
        return w, b

    w1, b1 = lin(ks[0], ks[1], state_dim, hidden)   # affine1: Linear(4, 128)
    wa, ba = lin(ks[2], ks[3], hidden, n_actions)   # action_head: Linear(128, n_actions)
    wv, bv = lin(ks[4], ks[5], hidden, 1)           # value_head: Linear(128, 1)
    return (w1, b1, wa, ba, wv, bv)


def reference_forward(x, params):
    w1, b1, wa, ba, wv, bv = params
    h = jnp.maximum(x @ w1 + b1, 0.0)
    logits = h @ wa + ba
    prob = jax.nn.softmax(logits, axis=-1)
    val = h @ wv + bv
    return prob, val


if __name__ == "__main__":
    key = jax.random.PRNGKey(0)
    kx, kx2, kp = jax.random.split(key, 3)

    STATE_DIM, N_ACTIONS = 4, 2
    params = init_params(kp, state_dim=STATE_DIM, hidden=HIDDEN, n_actions=N_ACTIONS)

    # One-time packing (hoisted out of the per-step hot path).
    packed = pack_params(params)  # head_dtype=jnp.bfloat16 for large-batch rollouts

    # Case 1: batched rollout — grid over row tiles (2 tiles of 128 rows).
    B1 = 256
    x1 = jax.random.normal(kx, (B1, STATE_DIM), jnp.float32)
    prob1, val1 = policy_forward(x1, packed)
    # Case 2: tiny batch (single grid point, block == full array).
    B2 = 8
    x2 = jax.random.normal(kx2, (B2, STATE_DIM), jnp.float32)
    prob2, val2 = policy_forward(x2, packed)
    jax.block_until_ready((prob1, val1, prob2, val2))

    # Sanity-check against a pure-JAX reference (exact divide -> tight tolerances).
    for x, prob, val, B in ((x1, prob1, val1, B1), (x2, prob2, val2, B2)):
        ref_prob, ref_val = reference_forward(x, params)
        assert prob.shape == (B, N_ACTIONS)
        assert val.shape == (B, 1)
        assert jnp.allclose(prob, ref_prob, atol=1e-4, rtol=1e-4)
        assert jnp.allclose(val, ref_val, atol=1e-4, rtol=1e-4)
        assert jnp.allclose(jnp.sum(prob, axis=-1), 1.0, atol=1e-5)

    print("KERNEL_OK")
</pallas_src>

<mosaic_0001>
module attributes {stable_mosaic.version = 11 : i64} {
  func.func @policy_kernel(%arg0: i32, %arg1: memref<128x4xf32, #tpu.memory_space<vmem>>, %arg2: memref<4x128xf32, #tpu.memory_space<vmem>>, %arg3: memref<128x128xf32, #tpu.memory_space<vmem>>, %arg4: memref<2x128xf32, #tpu.memory_space<vmem>>, %arg5: memref<128x2xf32, #tpu.memory_space<vmem>>, %arg6: memref<128x1xf32, #tpu.memory_space<vmem>>) attributes {dimension_semantics = [#tpu.dimension_semantics<parallel>], iteration_bounds = array<i64: 2>, scalar_prefetch = 0 : i64, scratch_operands = 0 : i64, tpu.core_type = #tpu.core_type<tc>, window_params = [{transform_indices = @transform_0, window_bounds = array<i64: 128, 4>}, {pipeline_mode = #tpu.pipeline_mode<synchronous>, transform_indices = @transform_1, window_bounds = array<i64: 4, 128>}, {pipeline_mode = #tpu.pipeline_mode<synchronous>, transform_indices = @transform_2, window_bounds = array<i64: 128, 128>}, {pipeline_mode = #tpu.pipeline_mode<synchronous>, transform_indices = @transform_3, window_bounds = array<i64: 2, 128>}, {transform_indices = @transform_4, window_bounds = array<i64: 128, 2>}, {transform_indices = @transform_5, window_bounds = array<i64: 128, 1>}]} {
    %c0 = arith.constant 0 : index
    %c0_0 = arith.constant 0 : index
    %0 = vector.load %arg1[%c0, %c0_0] : memref<128x4xf32, #tpu.memory_space<vmem>>, vector<128x4xf32>
    %c0_1 = arith.constant 0 : index
    %c0_2 = arith.constant 0 : index
    %1 = vector.load %arg2[%c0_1, %c0_2] : memref<4x128xf32, #tpu.memory_space<vmem>>, vector<4x128xf32>
    %c0_3 = arith.constant 0 : index
    %c0_4 = arith.constant 0 : index
    %2 = vector.load %arg4[%c0_3, %c0_4] : memref<2x128xf32, #tpu.memory_space<vmem>>, vector<1x128xf32>
    %c1 = arith.constant 1 : index
    %c0_5 = arith.constant 0 : index
    %3 = vector.load %arg4[%c1, %c0_5] : memref<2x128xf32, #tpu.memory_space<vmem>>, vector<1x128xf32>
    %4 = vector.extract_strided_slice %0 {offsets = [0, 0], sizes = [128, 1], strides = [1, 1]} : vector<128x4xf32> to vector<128x1xf32>
    %5 = vector.extract_strided_slice %1 {offsets = [0, 0], sizes = [1, 128], strides = [1, 1]} : vector<4x128xf32> to vector<1x128xf32>
    %6 = vector.broadcast %4 : vector<128x1xf32> to vector<128x128xf32>
    %7 = vector.broadcast %5 : vector<1x128xf32> to vector<128x128xf32>
    %8 = arith.mulf %6, %7 : vector<128x128xf32>
    %9 = vector.extract_strided_slice %0 {offsets = [0, 1], sizes = [128, 1], strides = [1, 1]} : vector<128x4xf32> to vector<128x1xf32>
    %10 = vector.extract_strided_slice %1 {offsets = [1, 0], sizes = [1, 128], strides = [1, 1]} : vector<4x128xf32> to vector<1x128xf32>
    %11 = vector.broadcast %9 : vector<128x1xf32> to vector<128x128xf32>
    %12 = vector.broadcast %10 : vector<1x128xf32> to vector<128x128xf32>
    %13 = arith.mulf %11, %12 : vector<128x128xf32>
    %14 = arith.addf %8, %13 : vector<128x128xf32>
    %15 = vector.extract_strided_slice %0 {offsets = [0, 2], sizes = [128, 1], strides = [1, 1]} : vector<128x4xf32> to vector<128x1xf32>
    %16 = vector.extract_strided_slice %1 {offsets = [2, 0], sizes = [1, 128], strides = [1, 1]} : vector<4x128xf32> to vector<1x128xf32>
    %17 = vector.broadcast %15 : vector<128x1xf32> to vector<128x128xf32>
    %18 = vector.broadcast %16 : vector<1x128xf32> to vector<128x128xf32>
    %19 = arith.mulf %17, %18 : vector<128x128xf32>
    %20 = arith.addf %14, %19 : vector<128x128xf32>
    %21 = vector.extract_strided_slice %0 {offsets = [0, 3], sizes = [128, 1], strides = [1, 1]} : vector<128x4xf32> to vector<128x1xf32>
    %22 = vector.extract_strided_slice %1 {offsets = [3, 0], sizes = [1, 128], strides = [1, 1]} : vector<4x128xf32> to vector<1x128xf32>
    %23 = vector.broadcast %21 : vector<128x1xf32> to vector<128x128xf32>
    %24 = vector.broadcast %22 : vector<1x128xf32> to vector<128x128xf32>
    %25 = arith.mulf %23, %24 : vector<128x128xf32>
    %26 = arith.addf %20, %25 : vector<128x128xf32>
    %27 = vector.broadcast %2 : vector<1x128xf32> to vector<128x128xf32>
    %28 = arith.addf %26, %27 : vector<128x128xf32>
    %cst = arith.constant 0.000000e+00 : f32
    %29 = vector.broadcast %cst : f32 to vector<128x128xf32>
    %30 = arith.maximumf %28, %29 : vector<128x128xf32>
    %c0_6 = arith.constant 0 : index
    %c0_7 = arith.constant 0 : index
    %31 = vector.load %arg3[%c0_6, %c0_7] : memref<128x128xf32, #tpu.memory_space<vmem>>, vector<128x128xf32>
    %cst_8 = arith.constant dense<0.000000e+00> : vector<128x128xf32>
    %32 = tpu.matmul %30, %31, %cst_8 {dimension_numbers = #tpu.dot_dimension_numbers<[1], [0], [0], [1], [0, 0, 1, 1], [], []>} : vector<128x128xf32>, vector<128x128xf32>, vector<128x128xf32> -> vector<128x128xf32>
    %33 = vector.broadcast %3 : vector<1x128xf32> to vector<128x128xf32>
    %34 = arith.addf %32, %33 : vector<128x128xf32>
    %35 = tpu.iota {dimensions = array<i32: 1>} : vector<128x128xi32>
    %c2_i32 = arith.constant 2 : i32
    %36 = vector.broadcast %c2_i32 : i32 to vector<128x128xi32>
    %37 = arith.cmpi slt, %35, %36 : vector<128x128xi32>
    %cst_9 = arith.constant 0xFF800000 : f32
    %38 = vector.broadcast %cst_9 : f32 to vector<128x128xf32>
    %39 = arith.select %37, %34, %38 : vector<128x128xi1>, vector<128x128xf32>
    %cst_10 = arith.constant dense<0xFF800000> : vector<128xf32>
    %40 = vector.multi_reduction <maximumf>, %39, %cst_10 [1] : vector<128x128xf32> to vector<128xf32>
    %41 = vector.shape_cast %40 : vector<128xf32> to vector<128x1xf32>
    %42 = vector.broadcast %41 : vector<128x1xf32> to vector<128x128xf32>
    %43 = arith.subf %39, %42 : vector<128x128xf32>
    %44 = math.exp %43 : vector<128x128xf32>
    %cst_11 = arith.constant 0.000000e+00 : f32
    %45 = vector.broadcast %cst_11 : f32 to vector<128x128xf32>
    %46 = arith.select %37, %44, %45 : vector<128x128xi1>, vector<128x128xf32>
    %cst_12 = arith.constant dense<0.000000e+00> : vector<128xf32>
    %47 = vector.multi_reduction <add>, %46, %cst_12 [1] : vector<128x128xf32> to vector<128xf32>
    %48 = vector.shape_cast %47 : vector<128xf32> to vector<128x1xf32>
    %49 = vector.broadcast %48 : vector<128x1xf32> to vector<128x128xf32>
    %50 = arith.divf %46, %49 : vector<128x128xf32>
    %51 = vector.extract_strided_slice %50 {offsets = [0, 0], sizes = [128, 2], strides = [1, 1]} : vector<128x128xf32> to vector<128x2xf32>
    %c0_13 = arith.constant 0 : index
    %c0_14 = arith.constant 0 : index
    %52 = vector.load %arg5[%c0_13, %c0_14] : memref<128x2xf32, #tpu.memory_space<vmem>>, vector<128x2xf32>
    tpu.vector_store %arg5[%c0_13, %c0_14], %51 {strides = array<i32>} : memref<128x2xf32, #tpu.memory_space<vmem>>, vector<128x2xf32>,
    %53 = vector.extract_strided_slice %34 {offsets = [0, 2], sizes = [128, 1], strides = [1, 1]} : vector<128x128xf32> to vector<128x1xf32>
    %c0_15 = arith.constant 0 : index
    %c0_16 = arith.constant 0 : index
    %54 = vector.load %arg6[%c0_15, %c0_16] : memref<128x1xf32, #tpu.memory_space<vmem>>, vector<128x1xf32>
    tpu.vector_store %arg6[%c0_15, %c0_16], %53 {strides = array<i32>} : memref<128x1xf32, #tpu.memory_space<vmem>>, vector<128x1xf32>,
    return
  }
  func.func @transform_0(%arg0: i32) -> (i32, i32) {
    %c0_i32 = arith.constant 0 : i32
    %c0_i32_0 = arith.constant 0 : i32
    return %arg0, %c0_i32 : i32, i32
  }
  func.func @transform_1(%arg0: i32) -> (i32, i32) {
    %c0_i32 = arith.constant 0 : i32
    %c0_i32_0 = arith.constant 0 : i32
    %c0_i32_1 = arith.constant 0 : i32
    return %c0_i32, %c0_i32_0 : i32, i32
  }
  func.func @transform_2(%arg0: i32) -> (i32, i32) {
    %c0_i32 = arith.constant 0 : i32
    %c0_i32_0 = arith.constant 0 : i32
    %c0_i32_1 = arith.constant 0 : i32
    return %c0_i32, %c0_i32_0 : i32, i32
  }
  func.func @transform_3(%arg0: i32) -> (i32, i32) {
    %c0_i32 = arith.constant 0 : i32
    %c0_i32_0 = arith.constant 0 : i32
    %c0_i32_1 = arith.constant 0 : i32
    return %c0_i32, %c0_i32_0 : i32, i32
  }
  func.func @transform_4(%arg0: i32) -> (i32, i32) {
    %c0_i32 = arith.constant 0 : i32
    %c0_i32_0 = arith.constant 0 : i32
    return %arg0, %c0_i32 : i32, i32
  }
  func.func @transform_5(%arg0: i32) -> (i32, i32) {
    %c0_i32 = arith.constant 0 : i32
    %c0_i32_0 = arith.constant 0 : i32
    return %arg0, %c0_i32 : i32, i32
  }
}

</mosaic_0001>

<bundles_post_ra>
// kernel: tpu_custom_call.1
= control target key start
LH: loop header
LB: loop body
LE: loop exit
PB: predicated region body
PF: predicated region fallthrough
CT: control target
= control target key end

     0   :  { %s1543_s18 = smov 0   ;;  %s2319_s0 = inlined_call_operand.vmem [shape: f32[256,4], index: 0, kind: input, shape index: {}]   ;;  %s2320_s1 = inlined_call_operand.vmem [shape: f32[4,128], index: 1, kind: input, shape index: {}]   ;;  %s2321_s2 = inlined_call_operand.vmem [shape: f32[128,128], index: 2, kind: input, shape index: {}]   ;;  %s2322_s3 = inlined_call_operand.vmem [shape: f32[2,128], index: 3, kind: input, shape index: {}]   ;;  %s2323_s4 = inlined_call_operand.vmem [shape: f32[256,2], index: 4, kind: output, shape index: {0}]   ;;  %s2324_s5 = inlined_call_operand.vmem [shape: f32[256,1], index: 5, kind: output, shape index: {1}]  }
   0x1 LB: > { %s1339_s19 = sadd.s32 4294967295, %s1506_s18   ;;  %p1343_p0 = scmp.ge.s32.totalorder %s1506_s18, 1  ;;  %s1506_s18 = sphi %s1543_s18, %s16_s18  }
   0x2   : > { %p191_p1 = scmp.lt.s32.totalorder %s1506_s18, 3 }
   0x4   : > { %p192_p2 = pnand %p1343_p0, %p191_p1 }
   0x5   : > { %s1344_s20 = sshll.u32 (!%p192_p2), %s1339_s19, 4  ;;  %s1512_s15 = smov (!%p192_p2), 126  }
   0x6   : > { %195 = sbr.rel (%p192_p2) target bundleno = 852 (0x354), region = 36  ;;  %p225_p3 = scmp.lt.s32.totalorder (!%p192_p2), %s1344_s20, 31 }
   0xb   : > { %v1508_v0 = vmov 0   ;;  %s2334_s20 = smov (!%p225_p3, %s1344_s20), 31  ;;  %v1509_v17 = vmov 1   ;;  %v1510_v18 = vmov 3   ;;  %v1511_v19 = vmov 2   ;;  %v697_v47 = vld [vmem:[%s2321_s2 + $0x78] sm:$0xff] }
   0xc   : > { %1415 = vset.pattern.permute.xlu2 %v1508_v0  ;;  %1414 = vset.pattern.permute.xlu1 %v1508_v0  ;;  %s1551_s21 = sshll.u32 %s2334_s20, 3  ;;  %v1660_v29 = vld [vmem:[%s2320_s1] sm:$0xf]  ;;  %v696_v48 = vld [vmem:[%s2321_s2 + $0x70] sm:$0xff]  ;;  %v695_v49 = vld [vmem:[%s2321_s2 + $0x68] sm:$0xff]  ;;  %vm1232_vm1 = vcmask 7168  }
   0xd   : > { %1413 = vset.pattern.permute.xlu0 %v1508_v0  ;;  %s1557_s24 = scalar_lea.vmem %s2319_s0, %s1551_s21  ;;  %v1664_v30 = vperm.slane %v1660_v29, 0  ;;  %v1667_v31 = vperm.slane %v1660_v29, 1  ;;  %1352 = vmatpush.msra.mxu1 %v697_v47  ;;  %v694_v55 = vld [vmem:[%s2321_s2 + $0x60] sm:$0xff]  ;;  %v693_v59 = vld [vmem:[%s2321_s2 + $0x58] sm:$0xff]  ;;  %v692_v61 = vld [vmem:[%s2321_s2 + $0x50] sm:$0xff]  ;;  %s2012_s19 = scalar_lea.vmem %s2324_s5, %s1551_s21  ;;  %vm1151_vm6 = vcmask 15360  }
   0xe   : > { %v246_v1 = vld [vmem:[%s1557_s24 + $0x20] sm:$0xff]  ;;  %v1561_v2 = vld [vmem:[%s1557_s24 + $0x10] sm:$0xff]  ;;  %v1569_v4 = vld [vmem:[%s1557_s24 + $0x28] sm:$0xff]  ;;  %1353 = vmatpush.msra.mxu2 %v697_v47  ;;  %1354 = vmatpush.msra.mxu3 %v697_v47  ;;  %s2176_s23 = scalar_lea.vmem %s2323_s4, %s1551_s21 }
   0xf   : > { %v1564_v3 = vld [vmem:[%s1557_s24] sm:$0xff]  ;;  %283 = vperm.xlu2 %1415, %v246_v1   ;;  %273 = vperm.xlu1 %1414, %v1561_v2   ;;  %v1572_v5 = vld [vmem:[%s1557_s24 + $0x18] sm:$0xff]  ;;  %v1575_v6 = vld [vmem:[%s1557_s24 + $0x8] sm:$0xff] }
  0x10   : > { %263 = vperm.xlu0 %1413, %v1564_v3   ;;  %v250_v7 = vld [vmem:[%s1557_s24 + $0x40] sm:$0xff]  ;;  %v1582_v8 = vld [vmem:[%s1557_s24 + $0x38] sm:$0xff]  ;;  %v1585_v9 = vld [vmem:[%s1557_s24 + $0x30] sm:$0xff]  ;;  %1355 = vmatpush.msra.mxu1 %v696_v48 }
  0x11   : > { %v1590_v10 = vld [vmem:[%s1557_s24 + $0x58] sm:$0xff]  ;;  %v1593_v11 = vld [vmem:[%s1557_s24 + $0x50] sm:$0xff]  ;;  %v1596_v12 = vld [vmem:[%s1557_s24 + $0x48] sm:$0xff]  ;;  %1356 = vmatpush.msra.mxu2 %v696_v48  ;;  %699 = vmatpush.msra.mxu0 %v697_v47 }
  0x12   : > { %v1602_v13 = vld [vmem:[%s1557_s24 + $0x70] sm:$0xff]  ;;  %v1605_v14 = vld [vmem:[%s1557_s24 + $0x68] sm:$0xff]  ;;  %v254_v15 = vld [vmem:[%s1557_s24 + $0x60] sm:$0xff]  ;;  %1358 = vmatpush.msra.mxu1 %v695_v49  ;;  %1357 = vmatpush.msra.mxu3 %v696_v48 }
  0x13   : > { %v1611_v16 = vld [vmem:[%s1557_s24 + $0x78] sm:$0xff]  ;;  %1359 = vmatpush.msra.mxu2 %v695_v49  ;;  %700 = vmatpush.msra.mxu0 %v696_v48  ;;  %v691_v62 = vld [vmem:[%s2321_s2 + $0x48] sm:$0xff] }
  0x14   : > { %1361 = vmatpush.msra.mxu1 %v694_v55  ;;  %1360 = vmatpush.msra.mxu3 %v695_v49 }
  0x15   : > { %1362 = vmatpush.msra.mxu2 %v694_v55  ;;  %701 = vmatpush.msra.mxu0 %v695_v49 }
  0x16   : > { %1364 = vmatpush.msra.mxu1 %v693_v59  ;;  %1363 = vmatpush.msra.mxu3 %v694_v55 }
  0x17   : > { %288 = vperm.xlu2 %1415, %v1569_v4   ;;  %278 = vperm.xlu1 %1414, %v1572_v5  }
  0x18   : > { %268 = vperm.xlu0 %1413, %v1575_v6   ;;  %1365 = vmatpush.msra.mxu2 %v693_v59 }
  0x19   : > { %1367 = vmatpush.msra.mxu1 %v692_v61  ;;  %702 = vmatpush.msra.mxu0 %v694_v55 }
  0x1a   : > { %1368 = vmatpush.msra.mxu2 %v692_v61  ;;  %1366 = vmatpush.msra.mxu3 %v693_v59 }
  0x1b   : > { %1370 = vmatpush.msra.mxu1 %v691_v62  ;;  %703 = vmatpush.msra.mxu0 %v693_v59 }
  0x1c   : > { %1371 = vmatpush.msra.mxu2 %v691_v62  ;;  %1369 = vmatpush.msra.mxu3 %v692_v61 }
  0x1d   : > { %704 = vmatpush.msra.mxu0 %v692_v61 }
  0x1e   : > { %1372 = vmatpush.msra.mxu3 %v691_v62 }
  0x1f   : > { %303 = vperm.xlu2 %1415, %v250_v7   ;;  %298 = vperm.xlu1 %1414, %v1582_v8  }
  0x20   : > { %293 = vperm.xlu0 %1413, %v1585_v9   ;;  %705 = vmatpush.msra.mxu0 %v691_v62 }
  0x27   : > { %318 = vperm.xlu2 %1415, %v1590_v10   ;;  %313 = vperm.xlu1 %1414, %v1593_v11  }
  0x28   : > { %308 = vperm.xlu0 %1413, %v1596_v12  }
  0x2f   : > { %333 = vperm.xlu2 %1415, %v1602_v13   ;;  %328 = vperm.xlu1 %1414, %v1605_v14  }
  0x30   : > { %323 = vperm.xlu0 %1413, %v254_v15  }
  0x37   : > { %1417 = vset.pattern.permute.xlu2 %v1509_v17  ;;  %1416 = vset.pattern.permute.xlu1 %v1509_v17 }
  0x38   : > { %338 = vperm.xlu0 %1413, %v1611_v16   ;;  %363 = vperm.xlu2 %1417, %v1575_v6  }
  0x39   : > { %359 = vperm.xlu1 %1416, %v1564_v3  }
  0x40   : > { %1418 = vset.pattern.permute.xlu0 %v1509_v17  ;;  %375 = vperm.xlu2 %1417, %v246_v1  }
  0x41   : > { %371 = vperm.xlu1 %1416, %v1572_v5   ;;  %367 = vperm.xlu0 %1418, %v1561_v2  }
  0x48   : > { %383 = vperm.xlu2 %1417, %v1585_v9  }
  0x49   : > { %379 = vperm.xlu1 %1416, %v1569_v4   ;;  %387 = vperm.xlu0 %1418, %v1582_v8  }
  0x50   : > { %395 = vperm.xlu2 %1417, %v1596_v12  }
  0x51   : > { %391 = vperm.xlu1 %1416, %v250_v7   ;;  %399 = vperm.xlu0 %1418, %v1593_v11  }
  0x58   : > { %407 = vperm.xlu2 %1417, %v254_v15  }
  0x59   : > { %403 = vperm.xlu1 %1416, %v1590_v10   ;;  %411 = vperm.xlu0 %1418, %v1605_v14  }
  0x60   : > { %419 = vperm.xlu2 %1417, %v1611_v16  }
  0x61   : > { %415 = vperm.xlu1 %1416, %v1602_v13   ;;  %1421 = vset.pattern.permute.xlu0 %v1510_v18 }
  0x62   : > { %585 = vperm.xlu0 %1421, %v250_v7  }
  0x68   : > { %1420 = vset.pattern.permute.xlu2 %v1511_v19 }
  0x69   : > { %1419 = vset.pattern.permute.xlu1 %v1511_v19  ;;  %v1630_v20 = vpop.permute.xlu2 %283  ;;  %464 = vperm.xlu2 %1420, %v1561_v2  }
  0x6a   : > { %460 = vperm.xlu1 %1419, %v1575_v6   ;;  %569 = vperm.xlu0 %1421, %v246_v1  }
  0x71   : > { %v1634_v21 = vpop.permute.xlu2 %288  ;;  %472 = vperm.xlu2 %1420, %v246_v1  }
  0x72   : > { %468 = vperm.xlu1 %1419, %v1572_v5   ;;  %609 = vperm.xlu0 %1421, %v1602_v13  }
  0x79   : > { %v1638_v22 = vpop.permute.xlu2 %303  ;;  %504 = vperm.xlu2 %1420, %v254_v15  }
  0x7a   : > { %488 = vperm.xlu1 %1419, %v250_v7   ;;  %577 = vperm.xlu0 %1421, %v1585_v9  }
  0x81   : > { %v1641_v23 = vpop.permute.xlu2 %318  ;;  %v1643_v24 = vpop.permute.xlu1 %273  ;;  %492 = vperm.xlu2 %1420, %v1596_v12  }
  0x82   : > { %1422 = vset.pattern.permute.xlu1 %v1510_v18  ;;  %1431 = vset.pattern.permute.xlu0 %v1511_v19  ;;  %v264_v25 = vpop.permute.xlu0 %263  ;;  %v344_v0 = vmul.f32 %v1664_v30, %v1643_v24 }
  0x83   : > { %601 = vperm.xlu1 %1422, %v254_v15   ;;  %456 = vperm.xlu0 %1431, %v1564_v3   ;;  %v342_v56 = vmul.f32 %v1664_v30, %v264_v25  ;;  %v686_v15 = vld [vmem:[%s2321_s2 + $0x20] sm:$0xff] }
  0x89   : > { %v1649_v26 = vpop.permute.xlu2 %333  ;;  %v1651_v27 = vpop.permute.xlu1 %278  ;;  %1424 = vset.pattern.permute.xlu2 %v1510_v18 }
  0x8a   : > { %v269_v28 = vpop.permute.xlu0 %268  ;;  %553 = vperm.xlu2 %1424, %v1564_v3  }
  0x8b   : > { %1423 = vset.pattern.permute.xlu1 %v1511_v19  ;;  %476 = vperm.xlu0 %1431, %v1569_v4   ;;  %v343_v32 = vmul.f32 %v1664_v30, %v269_v28 }
  0x8c   : > { %508 = vperm.xlu1 %1423, %v1605_v14  }
  0x91   : > { %v1670_v33 = vpop.permute.xlu1 %298 }
  0x92   : > { %v294_v34 = vpop.permute.xlu0 %293  ;;  %v364_v35 = vpop.permute.xlu2 %363  ;;  %605 = vperm.xlu2 %1424, %v1605_v14   ;;  %v688_v14 = vld [vmem:[%s2321_s2 + $0x30] sm:$0xff] }
  0x93   : > { %v424_v36 = vmul.f32 %v1667_v31, %v364_v35  ;;  %496 = vperm.xlu0 %1431, %v1593_v11   ;;  %v348_v44 = vmul.f32 %v1664_v30, %v294_v34 }
  0x94   : > { %1425 = vset.pattern.permute.xlu1 %v1510_v18 }
  0x95   : > { %v1676_v37 = vadd.f32 %v424_v36, %v343_v32  ;;  %589 = vperm.xlu1 %1425, %v1596_v12   ;;  %v349_v32 = vmul.f32 %v1664_v30, %v1670_v33  ;;  %v683_v33 = vld [vmem:[%s2321_s2 + $0x8] sm:$0xff] }
  0x99   : > { %v1679_v38 = vpop.permute.xlu1 %313 }
  0x9a   : > { %v309_v39 = vpop.permute.xlu0 %308  ;;  %v1681_v40 = vpop.permute.xlu2 %375  ;;  %557 = vperm.xlu2 %1424, %v1575_v6   ;;  %v345_v6 = vmul.f32 %v1664_v30, %v1651_v27  ;;  %v352_v48 = vmul.f32 %v1664_v30, %v1679_v38 }
  0x9b   : > { %484 = vperm.xlu0 %1431, %v1582_v8   ;;  %v351_v52 = vmul.f32 %v1664_v30, %v309_v39  ;;  %v427_v61 = vmul.f32 %v1667_v31, %v1681_v40  ;;  %v1828_v40 = vld [vmem:[%s2322_s3] ss:$0 sm:$0xff] }
  0x9d   : > { %1426 = vset.pattern.permute.xlu1 %v1511_v19 }
  0x9e   : > { %512 = vperm.xlu1 %1426, %v1602_v13  }
  0xa1   : > { %v1687_v41 = vpop.permute.xlu1 %328 }
  0xa2   : > { %v1689_v42 = vpop.permute.xlu0 %323  ;;  %v384_v43 = vpop.permute.xlu2 %383  ;;  %593 = vperm.xlu2 %1424, %v1593_v11   ;;  %v689_v11 = vld [vmem:[%s2321_s2 + $0x38] sm:$0xff] }
  0xa3   : > { %v429_v45 = vmul.f32 %v1667_v31, %v384_v43  ;;  %1433 = vset.pattern.permute.xlu0 %v1510_v18  ;;  %v685_v43 = vld [vmem:[%s2321_s2 + $0x18] sm:$0xff] }
  0xa5   : > { %v1695_v46 = vadd.f32 %v429_v45, %v348_v44  ;;  %v1790_v44 = vperm.slane %v1660_v29, 2  ;;  %v682_v45 = vld [vmem:[%s2321_s2] sm:$0xff] }
  0xa6   : > { %1427 = vset.pattern.permute.xlu1 %v1510_v18 }
  0xa7   : > { %573 = vperm.xlu1 %1427, %v1569_v4   ;;  %v690_v4 = vld [vmem:[%s2321_s2 + $0x40] sm:$0xff] }
  0xa8   : > { %1373 = vmatpush.msra.mxu1 %v690_v4  ;;  %1374 = vmatpush.msra.mxu2 %v690_v4 }
  0xa9   : > { %1375 = vmatpush.msra.mxu3 %v690_v4  ;;  %706 = vmatpush.msra.mxu0 %v690_v4 }
  0xaa   : > { %v1708_v50 = vpop.permute.xlu0 %338  ;;  %v396_v51 = vpop.permute.xlu2 %395  ;;  %1429 = vset.pattern.permute.xlu2 %v1511_v19  ;;  %1376 = vmatpush.msra.mxu1 %v689_v11 }
  0xab   : > { %v432_v53 = vmul.f32 %v1667_v31, %v396_v51  ;;  %v360_v54 = vpop.permute.xlu1 %359  ;;  %500 = vperm.xlu2 %1429, %v1590_v10   ;;  %1377 = vmatpush.msra.mxu2 %v689_v11  ;;  %v357_v24 = vmul.f32 %v1664_v30, %v1708_v50 }
  0xac   : > { %v423_v57 = vmul.f32 %v1667_v31, %v360_v54  ;;  %1379 = vmatpush.msra.mxu1 %v688_v14  ;;  %1378 = vmatpush.msra.mxu3 %v689_v11 }
  0xad   : > { %v1719_v58 = vadd.f32 %v432_v53, %v351_v52  ;;  %1380 = vmatpush.msra.mxu2 %v688_v14  ;;  %707 = vmatpush.msra.mxu0 %v689_v11  ;;  %v353_v53 = vmul.f32 %v1664_v30, %v1641_v23  ;;  %v346_v23 = vmul.f32 %v1664_v30, %v1630_v20 }
  0xae   : > { %v1724_v60 = vadd.f32 %v423_v57, %v342_v56  ;;  %1381 = vmatpush.msra.mxu3 %v688_v14 }
  0xaf   : > { %1428 = vset.pattern.permute.xlu1 %v1511_v19  ;;  %v347_v19 = vmul.f32 %v1664_v30, %v1634_v21  ;;  %708 = vmatpush.msra.mxu0 %v688_v14 }
  0xb0   : > { %480 = vperm.xlu1 %1428, %v1585_v9  }
  0xb2   : > { %v1734_v63 = vpop.permute.xlu2 %407 }
  0xb3   : > { %v372_v1 = vpop.permute.xlu1 %371  ;;  %v368_v3 = vpop.permute.xlu0 %367  ;;  %1430 = vset.pattern.permute.xlu2 %v1510_v18 }
  0xb4   : > { %v426_v7 = vmul.f32 %v1667_v31, %v372_v1  ;;  %v425_v9 = vmul.f32 %v1667_v31, %v368_v3  ;;  %561 = vperm.xlu2 %1430, %v1561_v2   ;;  %v687_v2 = vld [vmem:[%s2321_s2 + $0x28] sm:$0xff]  ;;  %v443_v1 = vadd.f32 %v427_v61, %v346_v23 }
  0xb5   : > { %1382 = vmatpush.msra.mxu1 %v687_v2  ;;  %1383 = vmatpush.msra.mxu2 %v687_v2 }
  0xb6   : > { %v1750_v12 = vadd.f32 %v426_v7, %v345_v6  ;;  %v441_v13 = vadd.f32 %v425_v9, %v344_v0  ;;  %1384 = vmatpush.msra.mxu3 %v687_v2  ;;  %709 = vmatpush.msra.mxu0 %v687_v2  ;;  %v1820_v0 = vperm.slane %v1660_v29, 3 }
  0xb7   : > { %1385 = vmatpush.msra.mxu1 %v686_v15  ;;  %1386 = vmatpush.msra.mxu2 %v686_v15 }
  0xb8   : > { %516 = vperm.xlu1 %1428, %v1611_v16   ;;  %1387 = vmatpush.msra.mxu3 %v686_v15 }
  0xb9   : > { %1388 = vmatpush.msra.mxu1 %v685_v43  ;;  %1389 = vmatpush.msra.mxu2 %v685_v43 }
  0xba   : > { %v420_v17 = vpop.permute.xlu2 %419  ;;  %710 = vmatpush.msra.mxu0 %v686_v15  ;;  %1390 = vmatpush.msra.mxu3 %v685_v43 }
  0xbb   : > { %v438_v25 = vmul.f32 %v1667_v31, %v420_v17  ;;  %v380_v27 = vpop.permute.xlu1 %379  ;;  %v388_v28 = vpop.permute.xlu0 %387 }
  0xbc   : > { %v428_v34 = vmul.f32 %v1667_v31, %v380_v27  ;;  %v430_v35 = vmul.f32 %v1667_v31, %v388_v28  ;;  %613 = vperm.xlu2 %1430, %v1611_v16   ;;  %v684_v16 = vld [vmem:[%s2321_s2 + $0x10] sm:$0xff]  ;;  %711 = vmatpush.msra.mxu0 %v685_v43 }
  0xbd   : > { %v1772_v21 = vadd.f32 %v438_v25, %v357_v24  ;;  %1391 = vmatpush.msra.mxu1 %v684_v16  ;;  %1392 = vmatpush.msra.mxu2 %v684_v16  ;;  %v350_v24 = vmul.f32 %v1664_v30, %v1638_v22 }
  0xbe   : > { %v1774_v36 = vadd.f32 %v428_v34, %v347_v19  ;;  %v1776_v39 = vadd.f32 %v430_v35, %v349_v32  ;;  %1393 = vmatpush.msra.mxu3 %v684_v16  ;;  %712 = vmatpush.msra.mxu0 %v684_v16  ;;  %v435_v16 = vmul.f32 %v1667_v31, %v1734_v63 }
  0xbf   : > { %1394 = vmatpush.msra.mxu1 %v683_v33  ;;  %1395 = vmatpush.msra.mxu2 %v683_v33 }
  0xc0   : > { %1432 = vset.pattern.permute.xlu1 %v1510_v18  ;;  %1396 = vmatpush.msra.mxu3 %v683_v33 }
  0xc1   : > { %597 = vperm.xlu1 %1432, %v1590_v10   ;;  %1397 = vmatpush.msra.mxu1 %v682_v45 }
  0xc2   : > { %1398 = vmatpush.msra.mxu2 %v682_v45  ;;  %713 = vmatpush.msra.mxu0 %v683_v33  ;;  %v354_v33 = vmul.f32 %v1664_v30, %v1689_v42 }
  0xc3   : > { %v392_v18 = vpop.permute.xlu1 %391  ;;  %v400_v47 = vpop.permute.xlu0 %399  ;;  %1399 = vmatpush.msra.mxu3 %v682_v45 }
  0xc4   : > { %v433_v49 = vmul.f32 %v1667_v31, %v400_v47  ;;  %v465_v10 = vpop.permute.xlu2 %464  ;;  %581 = vperm.xlu2 %1430, %v1582_v8   ;;  %714 = vmatpush.msra.mxu0 %v682_v45  ;;  %v431_v19 = vmul.f32 %v1667_v31, %v392_v18  ;;  %v451_v18 = vadd.f32 %v435_v16, %v354_v33 }
  0xc5   : > { %v522_v50 = vmul.f32 %v1790_v44, %v465_v10 }
  0xc6   : > { %v1800_v51 = vadd.f32 %v433_v49, %v352_v48  ;;  %v447_v28 = vadd.f32 %v431_v19, %v350_v24 }
  0xc7   : > { %v1802_v52 = vadd.f32 %v522_v50, %v441_v13 }
  0xc9   : > { %565 = vperm.xlu1 %1432, %v1572_v5  }
  0xcb   : > { %v404_v38 = vpop.permute.xlu1 %403  ;;  %v1805_v8 = vpop.permute.xlu0 %411 }
  0xcc   : > { %v434_v54 = vmul.f32 %v1667_v31, %v404_v38  ;;  %v473_v55 = vpop.permute.xlu2 %472  ;;  %v436_v23 = vmul.f32 %v1667_v31, %v1805_v8 }
  0xcd   : > { %v524_v62 = vmul.f32 %v1790_v44, %v473_v55 }
  0xce   : > { %v1810_v56 = vadd.f32 %v434_v54, %v353_v53 }
  0xcf   : > { %v540_v7 = vadd.f32 %v524_v62, %v443_v1 }
  0xd3   : > { %v1812_v5 = vpop.permute.xlu1 %415 }
  0xd4   : > { %v505_v57 = vpop.permute.xlu2 %504  ;;  %v586_v59 = vpop.permute.xlu0 %585 }
  0xd5   : > { %v625_v35 = vmul.f32 %v1820_v0, %v586_v59  ;;  %v532_v45 = vmul.f32 %v1790_v44, %v505_v57 }
  0xd7   : > { %v548_v50 = vadd.f32 %v532_v45, %v451_v18 }
  0xdc   : > { %v1822_v3 = vpop.permute.xlu2 %492  ;;  %v461_v4 = vpop.permute.xlu1 %460 }
  0xdd   : > { %v570_v6 = vpop.permute.xlu0 %569  ;;  %v521_v54 = vmul.f32 %v1790_v44, %v461_v4  ;;  %v355_v4 = vmul.f32 %v1664_v30, %v1687_v41  ;;  %v529_v19 = vmul.f32 %v1790_v44, %v1822_v3 }
  0xde   : > { %v621_v9 = vmul.f32 %v1820_v0, %v570_v6 }
  0xdf   : > { %v537_v62 = vadd.f32 %v521_v54, %v1676_v37 }
  0xe0   : > { %v637_v11 = vadd.f32 %v621_v9, %v540_v7 }
  0xe2   : > { %v654_v20 = vadd.f32 %v1828_v40, %v637_v11 }
  0xe4   : > { %v469_v13 = vpop.permute.xlu1 %468  ;;  %v554_v14 = vpop.permute.xlu2 %553  ;;  %v670_v29 = vmax.f32 %v654_v20, 0.0 }
  0xe5   : > { %v523_v2 = vmul.f32 %v1790_v44, %v469_v13  ;;  %v1832_v15 = vpop.permute.xlu0 %609  ;;  %v617_v38 = vmul.f32 %v1820_v0, %v554_v14  ;;  %v452_v13 = vadd.f32 %v436_v23, %v355_v4 }
  0xe6   : > { %727 = vmatmul.f32.vlgmr.msra.gmra.mxu1 %v670_v29 }
  0xe7   : > { %v1835_v17 = vadd.f32 %v523_v2, %v1750_v12 }
  0xec   : > { %v489_v25 = vpop.permute.xlu1 %488  ;;  %v606_v27 = vpop.permute.xlu2 %605 }
  0xed   : > { %v528_v32 = vmul.f32 %v1790_v44, %v489_v25  ;;  %v1841_v34 = vpop.permute.xlu0 %577  ;;  %v630_v14 = vmul.f32 %v1820_v0, %v606_v27 }
  0xef   : > { %v544_v43 = vadd.f32 %v528_v32, %v447_v28 }
  0xf1   : > { %v641_v12 = vadd.f32 %v625_v35, %v544_v43  ;;  %v545_v43 = vadd.f32 %v529_v19, %v1719_v58  ;;  %v356_v58 = vmul.f32 %v1664_v30, %v1649_v26 }
  0xf3   : > { %v658_v22 = vadd.f32 %v1828_v40, %v641_v12 }
  0xf4   : > { %v558_v47 = vpop.permute.xlu2 %557 }
  0xf5   : > { %v602_v48 = vpop.permute.xlu1 %601  ;;  %v457_v49 = vpop.permute.xlu0 %456  ;;  %v674_v10 = vmax.f32 %v658_v22, 0.0  ;;  %v618_v57 = vmul.f32 %v1820_v0, %v558_v47  ;;  %v437_v22 = vmul.f32 %v1667_v31, %v1812_v5  ;;  %v631_v31 = vmul.f32 %v1820_v0, %v1832_v15 }
  0xf6   : > { %v629_v53 = vmul.f32 %v1820_v0, %v602_v48  ;;  %v520_v63 = vmul.f32 %v1790_v44, %v457_v49 }
  0xf7   : > { %739 = vmatmul.f32.vlgmr.msra.gmra.mxu2 %v674_v10  ;;  %v634_v11 = vadd.f32 %v618_v57, %v537_v62 }
  0xf8   : > { %v645_v42 = vadd.f32 %v629_v53, %v548_v50  ;;  %v536_v55 = vadd.f32 %v520_v63, %v1724_v60  ;;  %v453_v50 = vadd.f32 %v437_v22, %v356_v58 }
  0xf9   : > { %v651_v37 = vadd.f32 %v1828_v40, %v634_v11  ;;  %v623_v11 = vmul.f32 %v1820_v0, %v1841_v34 }
  0xfa   : > { %v662_v59 = vadd.f32 %v1828_v40, %v645_v42  ;;  %v633_v61 = vadd.f32 %v617_v38, %v536_v55 }
  0xfb   : > { %v667_v32 = vmax.f32 %v651_v37, 0.0 }
  0xfc   : > { %v594_v1 = vpop.permute.xlu2 %593  ;;  %v678_v6 = vmax.f32 %v662_v59, 0.0  ;;  %v650_v7 = vadd.f32 %v1828_v40, %v633_v61 }
  0xfd   : > { %v477_v9 = vpop.permute.xlu0 %476  ;;  %v627_v3 = vmul.f32 %v1820_v0, %v594_v1 }
  0xfe   : > { %v509_v60 = vpop.permute.xlu1 %508  ;;  %751 = vmatmul.f32.vlgmr.msra.gmra.mxu3 %v678_v6  ;;  %v666_v20 = vmax.f32 %v650_v7, 0.0  ;;  %v525_v26 = vmul.f32 %v1790_v44, %v477_v9 }
  0xff   : > { %v533_v29 = vmul.f32 %v1790_v44, %v509_v60 }
 0x100   : > { %715 = vmatmul.f32.vlgmr.msra.gmra.mxu0 %v666_v20  ;;  %v541_v59 = vadd.f32 %v525_v26, %v1774_v36 }
 0x101   : > { %v549_v8 = vadd.f32 %v533_v29, %v452_v13 }
 0x103   : > { %v646_v2 = vadd.f32 %v630_v14, %v549_v8 }
 0x105   : > { %v497_v24 = vpop.permute.xlu0 %496  ;;  %v1868_v41 = vpop.permute.xlu2 %500  ;;  %v663_v25 = vadd.f32 %v1828_v40, %v646_v2 }
 0x106   : > { %v530_v28 = vmul.f32 %v1790_v44, %v497_v24 }
 0x107   : > { %v590_v35 = vpop.permute.xlu1 %589  ;;  %v679_v27 = vmax.f32 %v663_v25, 0.0 }
 0x108   : > { %v626_v16 = vmul.f32 %v1820_v0, %v590_v35  ;;  %718 = vmatmul.f32.gmra.mxu0 %v667_v32  ;;  %v546_v12 = vadd.f32 %v530_v28, %v1800_v51  ;;  %v531_v28 = vmul.f32 %v1790_v44, %v1868_v41 }
 0x109   : > { %754 = vmatmul.f32.gmra.mxu3 %v679_v27 }
 0x10a   : > { %v642_v33 = vadd.f32 %v626_v16, %v545_v43  ;;  %v643_v48 = vadd.f32 %v627_v3, %v546_v12  ;;  %v547_v43 = vadd.f32 %v531_v28, %v1810_v56 }
 0x10c   : > { %v659_v45 = vadd.f32 %v1828_v40, %v642_v33  ;;  %v660_v53 = vadd.f32 %v1828_v40, %v643_v48 }
 0x10d   : > { %v485_v6 = vpop.permute.xlu0 %484 }
 0x10e   : > { %v562_v18 = vpop.permute.xlu2 %561  ;;  %v675_v47 = vmax.f32 %v659_v45, 0.0  ;;  %v676_v30 = vmax.f32 %v660_v53, 0.0  ;;  %v527_v60 = vmul.f32 %v1790_v44, %v485_v6 }
 0x10f   : > { %v619_v49 = vmul.f32 %v1820_v0, %v562_v18  ;;  %v764_v18 = vlaneseq }
 0x110   : > { %v513_v10 = vpop.permute.xlu1 %512  ;;  %742 = vmatmul.f32.gmra.mxu2 %v675_v47  ;;  %v543_v14 = vadd.f32 %v527_v60, %v1776_v39  ;;  %v1919_v47 = vld [vmem:[%s2322_s3 + $0x1] ss:$0 sm:$0xff] }
 0x111   : > { %v635_v51 = vadd.f32 %v619_v49, %v1802_v52  ;;  %v534_v38 = vmul.f32 %v1790_v44, %v513_v10  ;;  %v1914_v56 = vand.u32 127, %v764_v18 }
 0x113   : > { %v550_v5 = vadd.f32 %v534_v38, %v453_v50  ;;  %v652_v63 = vadd.f32 %v1828_v40, %v635_v51  ;;  %vm766_vm0 = vcmp.lt.s32.totalorder %v1914_v56, 2 }
 0x115   : > { %v668_v54 = vmax.f32 %v652_v63, 0.0  ;;  %v647_v42 = vadd.f32 %v631_v31, %v550_v5 }
 0x116   : > { %v614_v61 = vpop.permute.xlu2 %613 }
 0x117   : > { %721 = vmatmul.f32.gmra.mxu0 %v668_v54  ;;  %v664_v55 = vadd.f32 %v1828_v40, %v647_v42  ;;  %v632_v37 = vmul.f32 %v1820_v0, %v614_v61 }
 0x118   : > { %745 = vmatmul.f32.gmra.mxu2 %v676_v30 }
 0x119   : > { %v574_v52 = vpop.permute.xlu1 %573  ;;  %v680_v57 = vmax.f32 %v664_v55, 0.0 }
 0x11a   : > { %v622_v23 = vmul.f32 %v1820_v0, %v574_v52 }
 0x11b   : > { %757 = vmatmul.f32.gmra.mxu3 %v680_v57 }
 0x11c   : > { %v638_v15 = vadd.f32 %v622_v23, %v541_v59 }
 0x11e   : > { %v655_v62 = vadd.f32 %v1828_v40, %v638_v15  ;;  %v582_v9 = vpop.permute.xlu2 %581 }
 0x11f   : > { %v624_v20 = vmul.f32 %v1820_v0, %v582_v9 }
 0x120   : > { %v671_v1 = vmax.f32 %v655_v62, 0.0 }
 0x121   : > { %v640_v2 = vadd.f32 %v624_v20, %v543_v14 }
 0x122   : > { %v481_v7 = vpop.permute.xlu1 %480  ;;  %730 = vmatmul.f32.gmra.mxu1 %v671_v1 }
 0x123   : > { %v526_v4 = vmul.f32 %v1790_v44, %v481_v7  ;;  %v657_v25 = vadd.f32 %v1828_v40, %v640_v2 }
 0x125   : > { %v542_v36 = vadd.f32 %v526_v4, %v1695_v46  ;;  %v673_v35 = vmax.f32 %v657_v25, 0.0 }
 0x127   : > { %v639_v13 = vadd.f32 %v623_v11, %v542_v36 }
 0x129   : > { %v656_v29 = vadd.f32 %v1828_v40, %v639_v13 }
 0x12a   : > { %v517_v8 = vpop.permute.xlu1 %516 }
 0x12b   : > { %v535_v19 = vmul.f32 %v1790_v44, %v517_v8  ;;  %v672_v24 = vmax.f32 %v656_v29, 0.0 }
 0x12d   : > { %v551_v34 = vadd.f32 %v535_v19, %v1772_v21  ;;  %733 = vmatmul.f32.gmra.mxu1 %v672_v24 }
 0x12f   : > { %v648_v46 = vadd.f32 %v632_v37, %v551_v34 }
 0x131   : > { %v665_v39 = vadd.f32 %v1828_v40, %v648_v46 }
 0x133   : > { %v598_v32 = vpop.permute.xlu1 %597  ;;  %v681_v27 = vmax.f32 %v665_v39, 0.0 }
 0x134   : > { %v628_v16 = vmul.f32 %v1820_v0, %v598_v32 }
 0x135   : > { %736 = vmatmul.f32.gmra.mxu1 %v673_v35  ;;  %760 = vmatmul.f32.gmra.mxu3 %v681_v27 }
 0x136   : > { %v644_v12 = vadd.f32 %v628_v16, %v547_v43 }
 0x138   : > { %v661_v21 = vadd.f32 %v1828_v40, %v644_v12 }
 0x13a   : > { %v677_v33 = vmax.f32 %v661_v21, 0.0 }
 0x13b   : > { %v566_v3 = vpop.permute.xlu1 %565 }
 0x13c   : > { %v620_v45 = vmul.f32 %v1820_v0, %v566_v3  ;;  %748 = vmatmul.f32.gmra.mxu2 %v677_v33 }
 0x13e   : > { %v636_v44 = vadd.f32 %v620_v45, %v1835_v17 }
 0x140   : > { %v653_v41 = vadd.f32 %v1828_v40, %v636_v44 }
 0x142   : > { %v669_v22 = vmax.f32 %v653_v41, 0.0 }
 0x144   : > { %724 = vmatmul.f32.gmra.mxu0 %v669_v22 }
 0x163   : > { %v728_v40 = vpop.f32.mrf.mxu1 }
 0x164   : > { %v729_v10 = vadd.f32 %v1919_v47, %v728_v40 }
 0x166   : > { %v1942_v51 = vsel %vm766_vm0, %v729_v10, -inf }
 0x17a   : > { %v740_v63 = vpop.f32.mrf.mxu2 }
 0x17b   : > { %v1950_v54 = vadd.f32 %v1919_v47, %v740_v63 }
 0x17d   : > { %v716_v48 = vpop.f32.mrf.mxu0  ;;  %v1955_v42 = vsel %vm766_vm0, %v1950_v54, -inf }
 0x17e   : > { %v717_v58 = vadd.f32 %v1919_v47, %v716_v48 }
 0x180   : > { %1184 = vrot.lane.b32.xlu2 %v717_v58, %s1512_s15  ;;  %v1926_v0 = vsel %vm766_vm0, %v717_v58, -inf }
 0x181   : > { %v752_v17 = vpop.f32.mrf.mxu3  ;;  %783 = vmax.xlane.f32.xlu1 %v1926_v0 }
 0x182   : > { %v1930_v49 = vadd.f32 %v1919_v47, %v752_v17 }
 0x184   : > { %v1936_v50 = vsel %vm766_vm0, %v1930_v49, -inf }
 0x185   : > { %807 = vmax.xlane.f32.xlu0 %v1936_v50  ;;  %v719_v38 = vpop.f32.mrf.mxu0 }
 0x186   : > { %v720_v53 = vadd.f32 %v1919_v47, %v719_v38 }
 0x188   : > { %1192 = vrot.lane.b32.xlu2 %v729_v10, %s1512_s15  ;;  %v1960_v26 = vsel %vm766_vm0, %v720_v53, -inf }
 0x189   : > { %791 = vmax.xlane.f32.xlu1 %v1942_v51 }
 0x18c   : > { %v755_v30 = vpop.f32.mrf.mxu3 }
 0x18d   : > { %v1981_v62 = vadd.f32 %v1919_v47, %v755_v30 }
 0x18f   : > { %v1992_v4 = vsel %vm766_vm0, %v1981_v62, -inf }
 0x193   : > { %v743_v55 = vpop.f32.mrf.mxu2 }
 0x194   : > { %v1964_v52 = vadd.f32 %v1919_v47, %v743_v55  ;;  %v722_v59 = vpop.f32.mrf.mxu0 }
 0x195   : > { %v723_v37 = vadd.f32 %v1919_v47, %v722_v59 }
 0x196   : > { %v1974_v23 = vsel %vm766_vm0, %v1964_v52, -inf }
 0x197   : > { %v2027_v34 = vsel %vm766_vm0, %v723_v37, -inf }
 0x199   : > { %1186 = vrot.lane.b32.xlu0 %v720_v53, %s1512_s15 }
 0x19b   : > { %v746_v6 = vpop.f32.mrf.mxu2 }
 0x19c   : > { %v747_v24 = vadd.f32 %v1919_v47, %v746_v6 }
 0x19e   : > { %v758_v61 = vpop.f32.mrf.mxu3  ;;  %v2039_v35 = vsel %vm766_vm0, %v747_v24, -inf }
 0x19f   : > { %v731_v31 = vpop.f32.mrf.mxu1  ;;  %v1978_v15 = vadd.f32 %v1919_v47, %v758_v61 }
 0x1a0   : > { %v732_v5 = vadd.f32 %v1919_v47, %v731_v31 }
 0x1a1   : > { %v1986_v1 = vsel %vm766_vm0, %v1978_v15, -inf }
 0x1a2   : > { %1194 = vrot.lane.b32.xlu1 %v732_v5, %s1512_s15  ;;  %v1968_v57 = vsel %vm766_vm0, %v732_v5, -inf }
 0x1aa   : > { %v734_v36 = vpop.f32.mrf.mxu1 }
 0x1ab   : > { %v735_v13 = vadd.f32 %v1919_v47, %v734_v36 }
 0x1ad   : > { %v2032_v28 = vsel %vm766_vm0, %v735_v13, -inf }
 0x1b1   : > { %799 = vmax.xlane.f32.xlu2 %v1955_v42 }
 0x1b2   : > { %v737_v2 = vpop.f32.mrf.mxu1 }
 0x1b3   : > { %v738_v19 = vadd.f32 %v1919_v47, %v737_v2 }
 0x1b5   : > { %v2047_v12 = vsel %vm766_vm0, %v738_v19, -inf }
 0x1b8   : > { %v761_v40 = vpop.f32.mrf.mxu3 }
 0x1b9   : > { %785 = vmax.xlane.f32.xlu2 %v1960_v26  ;;  %v2071_v38 = vadd.f32 %v1919_v47, %v761_v40 }
 0x1bb   : > { %v2076_v5 = vsel %vm766_vm0, %v2071_v38, -inf }
 0x1bf   : > { %v749_v60 = vpop.f32.mrf.mxu2 }
 0x1c0   : > { %v750_v20 = vadd.f32 %v1919_v47, %v749_v60 }
 0x1c1   : > { %793 = vmax.xlane.f32.xlu2 %v1968_v57  ;;  %v725_v7 = vpop.f32.mrf.mxu0 }
 0x1c2   : > { %v726_v9 = vadd.f32 %v1919_v47, %v725_v7  ;;  %v2006_v14 = vsel %vm766_vm0, %v750_v20, -inf }
 0x1c3   : > { %801 = vmax.xlane.f32.xlu0 %v1974_v23 }
 0x1c4   : > { %v1998_v11 = vsel %vm766_vm0, %v726_v9, -inf }
 0x1c9   : > { %811 = vmax.xlane.f32.xlu2 %v1986_v1 }
 0x1cc   : > { %809 = vmax.xlane.f32.xlu1 %v1992_v4 }
 0x1d1   : > { %789 = vmax.xlane.f32.xlu2 %v1998_v11 }
 0x1d7   : > { %1196 = vrot.lane.b32.xlu0 %v735_v13, %s1512_s15 }
 0x1d9   : > { %805 = vmax.xlane.f32.xlu2 %v2006_v14 }
 0x1da   : > { %v1185_v29 = vpop.permute.xlu2 %1184 }
 0x1db   : > { %1233 = vst.msk [vmem:[%s2012_s19] sm:$0xff] %vm1232_vm1, %v1185_v29 }
 0x1e2   : > { %v1193_v8 = vpop.permute.xlu2 %1192 }
 0x1e3   : > { %1237 = vst.msk [vmem:[%s2012_s19 + $0x20] sm:$0xff] %vm1232_vm1, %v1193_v8 }
 0x1e5   : > { %1188 = vrot.lane.b32.xlu1 %v723_v37, %s1512_s15 }
 0x1f1   : > { %1198 = vrot.lane.b32.xlu2 %v738_v19, %s1512_s15 }
 0x1f4   : > { %v784_v25 = vpop.xlane.xlu1 %783 }
 0x1f5   : > { %v815_v30 = vsub.f32 %v1926_v0, %v784_v25 }
 0x1f7   : > { %v831_v55 = vmul.f32 1.442695, %v815_v30 }
 0x1f8   : > { %v808_v46 = vpop.xlane.xlu0 %807 }
 0x1f9   : > { %1204 = vrot.lane.b32.xlu2 %v747_v24, %s1512_s15  ;;  %v827_v6 = vsub.f32 %v1936_v50, %v808_v46 }
 0x1fb   : > { %v855_v7 = vmul.f32 1.442695, %v827_v6 }
 0x1fc   : > { %v792_v32 = vpop.xlane.xlu1 %791 }
 0x1fd   : > { %v819_v27 = vsub.f32 %v1942_v51, %v792_v32 }
 0x1ff   : > { %v839_v43 = vmul.f32 1.442695, %v819_v27 }
 0x201   : > { %787 = vmax.xlane.f32.xlu0 %v2027_v34  ;;  %1436 = vpow2.f32 %v839_v43 }
 0x207   : > { %v1437_v21 = vpop.eup %1436 }
 0x208   : > { %v2053_v33 = vsel %vm766_vm0, %v1437_v21, 0.0 }
 0x209   : > { %795 = vmax.xlane.f32.xlu0 %v2032_v28 }
 0x20b   : > { %v1187_v39 = vpop.permute.xlu0 %1186 }
 0x20c   : > { %1234 = vst.msk [vmem:[%s2012_s19 + $0x8] sm:$0xff] %vm1232_vm1, %v1187_v39 }
 0x20f   : > { %803 = vmax.xlane.f32.xlu1 %v2039_v35 }
 0x214   : > { %v1195_v16 = vpop.permute.xlu1 %1194 }
 0x215   : > { %1238 = vst.msk [vmem:[%s2012_s19 + $0x28] sm:$0xff] %vm1232_vm1, %v1195_v16 }
 0x217   : > { %797 = vmax.xlane.f32.xlu1 %v2047_v12 }
 0x21d   : > { %1190 = vrot.lane.b32.xlu0 %v726_v9, %s1512_s15 }
 0x222   : > { %887 = vadd.xlane.f32.xlu2 %v2053_v33 }
 0x224   : > { %v800_v3 = vpop.xlane.xlu2 %799 }
 0x225   : > { %v823_v29 = vsub.f32 %v1955_v42, %v800_v3 }
 0x227   : > { %v847_v2 = vmul.f32 1.442695, %v823_v29 }
 0x22c   : > { %v786_v45 = vpop.xlane.xlu2 %785 }
 0x22d   : > { %v816_v44 = vsub.f32 %v1960_v26, %v786_v45 }
 0x22f   : > { %v833_v41 = vmul.f32 1.442695, %v816_v44 }
 0x230   : > { %1200 = vrot.lane.b32.xlu1 %v1950_v54, %s1512_s15 }
 0x231   : > { %1438 = vpow2.f32 %v833_v41 }
 0x234   : > { %v2059_v22 = vpop.xlane.xlu2 %793 }
 0x235   : > { %v820_v46 = vsub.f32 %v1968_v57, %v2059_v22 }
 0x236   : > { %v802_v51 = vpop.xlane.xlu0 %801 }
 0x237   : > { %v1439_v18 = vpop.eup %1438  ;;  %v824_v0 = vsub.f32 %v1974_v23, %v802_v51  ;;  %v841_v42 = vmul.f32 1.442695, %v820_v46 }
 0x238   : > { %1206 = vrot.lane.b32.xlu1 %v750_v20, %s1512_s15  ;;  %v2064_v48 = vsel %vm766_vm0, %v1439_v18, 0.0 }
 0x239   : > { %881 = vadd.xlane.f32.xlu2 %v2064_v48  ;;  %v849_v50 = vmul.f32 1.442695, %v824_v0 }
 0x23c   : > { %v2067_v58 = vpop.xlane.xlu2 %811 }
 0x23d   : > { %v829_v18 = vsub.f32 %v1986_v1, %v2067_v58 }
 0x23f   : > { %v810_v17 = vpop.xlane.xlu1 %809  ;;  %v859_v51 = vmul.f32 1.442695, %v829_v18 }
 0x240   : > { %v828_v10 = vsub.f32 %v1992_v4, %v810_v17 }
 0x242   : > { %v857_v53 = vmul.f32 1.442695, %v828_v10 }
 0x244   : > { %1440 = vpow2.f32 %v857_v53  ;;  %v790_v31 = vpop.xlane.xlu2 %789 }
 0x245   : > { %1442 = vpow2.f32 %v831_v55  ;;  %v818_v37 = vsub.f32 %v1998_v11, %v790_v31 }
 0x246   : > { %1444 = vpow2.f32 %v855_v7 }
 0x247   : > { %813 = vmax.xlane.f32.xlu0 %v2076_v5  ;;  %1446 = vpow2.f32 %v849_v50  ;;  %v837_v24 = vmul.f32 1.442695, %v818_v37 }
 0x249   : > { %v1197_v63 = vpop.permute.xlu0 %1196 }
 0x24a   : > { %v1441_v54 = vpop.eup %1440  ;;  %1239 = vst.msk [vmem:[%s2012_s19 + $0x30] sm:$0xff] %vm1232_vm1, %v1197_v63 }
 0x24b   : > { %v2083_v47 = vsel %vm766_vm0, %v1441_v54, 0.0  ;;  %v1443_v9 = vpop.eup %1442 }
 0x24c   : > { %v2085_v26 = vpop.xlane.xlu2 %805  ;;  %905 = vadd.xlane.f32.xlu2 %v2083_v47  ;;  %v2101_v60 = vsel %vm766_vm0, %v1443_v9, 0.0  ;;  %v1445_v36 = vpop.eup %1444 }
 0x24d   : > { %v1447_v20 = vpop.eup %1446  ;;  %v826_v1 = vsub.f32 %v2006_v14, %v2085_v26 }
 0x24e   : > { %v2113_v23 = vsel %vm766_vm0, %v1447_v20, 0.0 }
 0x24f   : > { %v853_v30 = vmul.f32 1.442695, %v826_v1 }
 0x254   : > { %v1199_v59 = vpop.permute.xlu2 %1198 }
 0x255   : > { %1240 = vst.msk [vmem:[%s2012_s19 + $0x38] sm:$0xff] %vm1232_vm1, %v1199_v59 }
 0x257   : > { %v1189_v61 = vpop.permute.xlu1 %1188 }
 0x258   : > { %1235 = vst.msk [vmem:[%s2012_s19 + $0x10] sm:$0xff] %vm1232_vm1, %v1189_v61 }
 0x25b   : > { %1202 = vrot.lane.b32.xlu0 %v1964_v52, %s1512_s15  ;;  %v2108_v52 = vsel %vm766_vm0, %v1445_v36, 0.0 }
 0x25c   : > { %v1205_v4 = vpop.permute.xlu2 %1204 }
 0x25d   : > { %1243 = vst.msk [vmem:[%s2012_s19 + $0x50] sm:$0xff] %vm1232_vm1, %v1205_v4 }
 0x262   : > { %879 = vadd.xlane.f32.xlu1 %v2101_v60 }
 0x263   : > { %1208 = vrot.lane.b32.xlu0 %v1930_v49, %s1512_s15 }
 0x26a   : > { %903 = vadd.xlane.f32.xlu1 %v2108_v52 }
 0x272   : > { %897 = vadd.xlane.f32.xlu1 %v2113_v23 }
 0x274   : > { %v788_v13 = vpop.xlane.xlu0 %787 }
 0x275   : > { %v817_v16 = vsub.f32 %v2027_v34, %v788_v13 }
 0x277   : > { %v835_v41 = vmul.f32 1.442695, %v817_v16 }
 0x27c   : > { %v796_v49 = vpop.xlane.xlu0 %795 }
 0x27d   : > { %v821_v8 = vsub.f32 %v2032_v28, %v796_v49 }
 0x27f   : > { %v843_v19 = vmul.f32 1.442695, %v821_v8 }
 0x281   : > { %1448 = vpow2.f32 %v843_v19 }
 0x282   : > { %v804_v25 = vpop.xlane.xlu1 %803  ;;  %1450 = vpow2.f32 %v847_v2 }
 0x283   : > { %v825_v39 = vsub.f32 %v2039_v35, %v804_v25  ;;  %1452 = vpow2.f32 %v837_v24 }
 0x285   : > { %v851_v32 = vmul.f32 1.442695, %v825_v39 }
 0x287   : > { %v1449_v27 = vpop.eup %1448  ;;  %1454 = vpow2.f32 %v851_v32 }
 0x288   : > { %v2124_v28 = vsel %vm766_vm0, %v1449_v27, 0.0  ;;  %v1451_v11 = vpop.eup %1450  ;;  %1456 = vpow2.f32 %v841_v42 }
 0x289   : > { %891 = vadd.xlane.f32.xlu1 %v2124_v28  ;;  %v1453_v35 = vpop.eup %1452  ;;  %v2131_v21 = vsel %vm766_vm0, %v1451_v11, 0.0 }
 0x28a   : > { %v798_v43 = vpop.xlane.xlu1 %797 }
 0x28b   : > { %v822_v57 = vsub.f32 %v2047_v12, %v798_v43  ;;  %v2143_v12 = vsel %vm766_vm0, %v1453_v35, 0.0 }
 0x28d   : > { %v1455_v3 = vpop.eup %1454  ;;  %v845_v45 = vmul.f32 1.442695, %v822_v57  ;;  %895 = vadd.xlane.f32.xlu0 %v2131_v21 }
 0x28e   : > { %v2136_v44 = vsel %vm766_vm0, %v1455_v3, 0.0  ;;  %v1457_v22 = vpop.eup %1456 }
 0x28f   : > { %1458 = vpow2.f32 %v845_v45  ;;  %899 = vadd.xlane.f32.xlu2 %v2136_v44  ;;  %v1191_v34 = vpop.permute.xlu0 %1190  ;;  %v2150_v40 = vsel %vm766_vm0, %v1457_v22, 0.0 }
 0x290   : > { %1236 = vst.msk [vmem:[%s2012_s19 + $0x18] sm:$0xff] %vm1232_vm1, %v1191_v34  ;;  %1460 = vpow2.f32 %v835_v41 }
 0x291   : > { %885 = vadd.xlane.f32.xlu1 %v2143_v12 }
 0x295   : > { %v1459_v17 = vpop.eup %1458  ;;  %889 = vadd.xlane.f32.xlu0 %v2150_v40  ;;  %v888_v10 = vpop.xlane.xlu2 %887 }
 0x296   : > { %1462 = vrcp.f32 %v888_v10  ;;  %v2155_v53 = vsel %vm766_vm0, %v1459_v17, 0.0  ;;  %v1461_v31 = vpop.eup %1460  ;;  %v982_v59 = vand.u32 2147483648, %v888_v10  ;;  %v980_v7 = vand.u32 2147483647, %v888_v10 }
 0x297   : > { %893 = vadd.xlane.f32.xlu2 %v2155_v53  ;;  %1464 = vpow2.f32 %v859_v51  ;;  %v2162_v63 = vsel %vm766_vm0, %v1461_v31, 0.0  ;;  %vm976_vm3 = vweird.f32 %v888_v10 }
 0x298   : > { %1466 = vpow2.f32 %v853_v30  ;;  %v983_v26 = vor.u32 1.1754944e-38, %v982_v59  ;;  %vm981_vm5 = vcmp.eq.f32.partialorder %v980_v7, 8.507059e+37 }
 0x29c   : > { %v1463_v58 = vpop.eup %1462 }
 0x29d   : > { %v972_v54 = vmul.f32 %v1463_v58, %v888_v10  ;;  %883 = vadd.xlane.f32.xlu0 %v2162_v63  ;;  %v1465_v61 = vpop.eup %1464  ;;  %vm977_vm2 = vweird.f32 %v1463_v58 }
 0x29e   : > { %vm978_vm4 = vmor %vm976_vm3, %vm977_vm2  ;;  %v2169_v9 = vsel %vm766_vm0, %v1465_v61, 0.0  ;;  %v1467_v20 = vpop.eup %1466 }
 0x29f   : > { %v973_v55 = vsub.f32 1.0, %v972_v54  ;;  %v2185_v49 = vsel %vm766_vm0, %v1467_v20, 0.0 }
 0x2a1   : > { %v974_v6 = vmul.f32 %v1463_v58, %v973_v55 }
 0x2a2   : > { %v1201_v4 = vpop.permute.xlu1 %1200 }
 0x2a3   : > { %v975_v14 = vadd.f32 %v1463_v58, %v974_v6  ;;  %1241 = vst.msk [vmem:[%s2012_s19 + $0x40] sm:$0xff] %vm1232_vm1, %v1201_v4 }
 0x2a5   : > { %v979_v0 = vsel %vm978_vm4, %v1463_v58, %v975_v14  ;;  %907 = vadd.xlane.f32.xlu0 %v2169_v9 }
 0x2a6   : > { %v984_v50 = vsel %vm981_vm5, %v983_v26, %v979_v0 }
 0x2a7   : > { %v985_v36 = vmul.f32 %v984_v50, %v2053_v33 }
 0x2a9   : > { %1156 = vst.msk [vmem:[%s2176_s23 + $0x20] sm:$0xff] %vm1151_vm6, %v985_v36 }
 0x2aa   : > { %v1207_v13 = vpop.permute.xlu1 %1206 }
 0x2ab   : > { %1244 = vst.msk [vmem:[%s2012_s19 + $0x58] sm:$0xff] %vm1232_vm1, %v1207_v13 }
 0x2ac   : > { %v882_v29 = vpop.xlane.xlu2 %881 }
 0x2ad   : > { %1468 = vrcp.f32 %v882_v29  ;;  %901 = vadd.xlane.f32.xlu0 %v2185_v49  ;;  %v937_v2 = vand.u32 2147483648, %v882_v29  ;;  %v935_v24 = vand.u32 2147483647, %v882_v29  ;;  %vm931_vm8 = vweird.f32 %v882_v29 }
 0x2af   : > { %1210 = vrot.lane.b32.xlu2 %v1981_v62, %s1512_s15  ;;  %v938_v39 = vor.u32 1.1754944e-38, %v937_v2  ;;  %vm936_vm10 = vcmp.eq.f32.partialorder %v935_v24, 8.507059e+37 }
 0x2b3   : > { %v1469_v8 = vpop.eup %1468 }
 0x2b4   : > { %v927_v37 = vmul.f32 %v1469_v8, %v882_v29  ;;  %vm932_vm7 = vweird.f32 %v1469_v8 }
 0x2b5   : > { %vm933_vm9 = vmor %vm931_vm8, %vm932_vm7 }
 0x2b6   : > { %v928_v33 = vsub.f32 1.0, %v927_v37 }
 0x2b8   : > { %v929_v19 = vmul.f32 %v1469_v8, %v928_v33 }
 0x2ba   : > { %v930_v25 = vadd.f32 %v1469_v8, %v929_v19  ;;  %v814_v46 = vpop.xlane.xlu0 %813 }
 0x2bb   : > { %v830_v32 = vsub.f32 %v2076_v5, %v814_v46 }
 0x2bc   : > { %v934_v27 = vsel %vm933_vm9, %v1469_v8, %v930_v25 }
 0x2bd   : > { %v939_v42 = vsel %vm936_vm10, %v938_v39, %v934_v27  ;;  %v861_v11 = vmul.f32 1.442695, %v830_v32 }
 0x2be   : > { %v940_v62 = vmul.f32 %v939_v42, %v2064_v48 }
 0x2bf   : > { %1470 = vpow2.f32 %v861_v11  ;;  %v906_v43 = vpop.xlane.xlu2 %905 }
 0x2c0   : > { %1153 = vst.msk [vmem:[%s2176_s23 + $0x8] sm:$0xff] %vm1151_vm6, %v940_v62  ;;  %1472 = vrcp.f32 %v906_v43  ;;  %v1117_v3 = vand.u32 2147483648, %v906_v43  ;;  %v1115_v41 = vand.u32 2147483647, %v906_v43  ;;  %vm1111_vm12 = vweird.f32 %v906_v43 }
 0x2c1   : > { %1214 = vrot.lane.b32.xlu0 %v2071_v38, %s1512_s15 }
 0x2c2   : > { %v1118_v22 = vor.u32 1.1754944e-38, %v1117_v3  ;;  %vm1116_vm14 = vcmp.eq.f32.partialorder %v1115_v41, 8.507059e+37 }
 0x2c5   : > { %v1471_v16 = vpop.eup %1470 }
 0x2c6   : > { %v1473_v57 = vpop.eup %1472  ;;  %v2198_v5 = vsel %vm766_vm0, %v1471_v16, 0.0 }
 0x2c7   : > { %v1107_v35 = vmul.f32 %v1473_v57, %v906_v43  ;;  %909 = vadd.xlane.f32.xlu1 %v2198_v5  ;;  %vm1112_vm11 = vweird.f32 %v1473_v57 }
 0x2c8   : > { %vm1113_vm13 = vmor %vm1111_vm12, %vm1112_vm11 }
 0x2c9   : > { %v1108_v48 = vsub.f32 1.0, %v1107_v35 }
 0x2cb   : > { %v1109_v45 = vmul.f32 %v1473_v57, %v1108_v48 }
 0x2cd   : > { %v1110_v34 = vadd.f32 %v1473_v57, %v1109_v45  ;;  %v1203_v38 = vpop.permute.xlu0 %1202 }
 0x2ce   : > { %1242 = vst.msk [vmem:[%s2012_s19 + $0x48] sm:$0xff] %vm1232_vm1, %v1203_v38 }
 0x2cf   : > { %v1114_v56 = vsel %vm1113_vm13, %v1473_v57, %v1110_v34 }
 0x2d0   : > { %v1119_v18 = vsel %vm1116_vm14, %v1118_v22, %v1114_v56 }
 0x2d1   : > { %v1120_v17 = vmul.f32 %v1119_v18, %v2083_v47 }
 0x2d3   : > { %1165 = vst.msk [vmem:[%s2176_s23 + $0x68] sm:$0xff] %vm1151_vm6, %v1120_v17 }
 0x2d5   : > { %v880_v10 = vpop.xlane.xlu1 %879  ;;  %v1209_v51 = vpop.permute.xlu0 %1208 }
 0x2d6   : > { %1474 = vrcp.f32 %v880_v10  ;;  %1245 = vst.msk [vmem:[%s2012_s19 + $0x60] sm:$0xff] %vm1232_vm1, %v1209_v51  ;;  %v922_v30 = vand.u32 2147483648, %v880_v10  ;;  %v920_v47 = vand.u32 2147483647, %v880_v10  ;;  %vm916_vm0 = vweird.f32 %v880_v10 }
 0x2d8   : > { %v923_v6 = vor.u32 1.1754944e-38, %v922_v30  ;;  %vm921_vm3 = vcmp.eq.f32.partialorder %v920_v47, 8.507059e+37 }
 0x2dc   : > { %v1475_v31 = vpop.eup %1474 }
 0x2dd   : > { %v912_v1 = vmul.f32 %v1475_v31, %v880_v10  ;;  %v904_v58 = vpop.xlane.xlu1 %903  ;;  %vm917_vm15 = vweird.f32 %v1475_v31 }
 0x2de   : > { %1476 = vrcp.f32 %v904_v58  ;;  %vm918_vm2 = vmor %vm916_vm0, %vm917_vm15  ;;  %v1102_v36 = vand.u32 2147483648, %v904_v58  ;;  %v1100_v20 = vand.u32 2147483647, %v904_v58  ;;  %vm1096_vm5 = vweird.f32 %v904_v58 }
 0x2df   : > { %v913_v54 = vsub.f32 1.0, %v912_v1 }
 0x2e0   : > { %1212 = vrot.lane.b32.xlu1 %v1978_v15, %s1512_s15  ;;  %v1103_v8 = vor.u32 1.1754944e-38, %v1102_v36  ;;  %vm1101_vm8 = vcmp.eq.f32.partialorder %v1100_v20, 8.507059e+37 }
 0x2e1   : > { %v914_v55 = vmul.f32 %v1475_v31, %v913_v54 }
 0x2e3   : > { %v915_v59 = vadd.f32 %v1475_v31, %v914_v55 }
 0x2e4   : > { %v1477_v61 = vpop.eup %1476 }
 0x2e5   : > { %v919_v7 = vsel %vm918_vm2, %v1475_v31, %v915_v59  ;;  %v1092_v4 = vmul.f32 %v1477_v61, %v904_v58  ;;  %v898_v14 = vpop.xlane.xlu1 %897  ;;  %vm1097_vm4 = vweird.f32 %v1477_v61 }
 0x2e6   : > { %v924_v26 = vsel %vm921_vm3, %v923_v6, %v919_v7  ;;  %1478 = vrcp.f32 %v898_v14  ;;  %vm1098_vm7 = vmor %vm1096_vm5, %vm1097_vm4  ;;  %v1057_v24 = vand.u32 2147483648, %v898_v14  ;;  %v1055_v46 = vand.u32 2147483647, %v898_v14 }
 0x2e7   : > { %v925_v0 = vmul.f32 %v924_v26, %v2101_v60  ;;  %v1093_v50 = vsub.f32 1.0, %v1092_v4  ;;  %vm1051_vm10 = vweird.f32 %v898_v14 }
 0x2e8   : > { %v1058_v32 = vor.u32 1.1754944e-38, %v1057_v24  ;;  %vm1056_vm12 = vcmp.eq.f32.partialorder %v1055_v46, 8.507059e+37 }
 0x2e9   : > { %1152 = vst.msk [vmem:[%s2176_s23] sm:$0xff] %vm1151_vm6, %v925_v0  ;;  %v1094_v15 = vmul.f32 %v1477_v61, %v1093_v50 }
 0x2eb   : > { %v1095_v13 = vadd.f32 %v1477_v61, %v1094_v15 }
 0x2ec   : > { %v1479_v29 = vpop.eup %1478 }
 0x2ed   : > { %v1099_v37 = vsel %vm1098_vm7, %v1477_v61, %v1095_v13  ;;  %v1047_v33 = vmul.f32 %v1479_v29, %v898_v14  ;;  %vm1052_vm9 = vweird.f32 %v1479_v29 }
 0x2ee   : > { %v1104_v2 = vsel %vm1101_vm8, %v1103_v8, %v1099_v37  ;;  %vm1053_vm11 = vmor %vm1051_vm10, %vm1052_vm9 }
 0x2ef   : > { %v1105_v60 = vmul.f32 %v1104_v2, %v2108_v52  ;;  %v1048_v19 = vsub.f32 1.0, %v1047_v33 }
 0x2f1   : > { %1164 = vst.msk [vmem:[%s2176_s23 + $0x60] sm:$0xff] %vm1151_vm6, %v1105_v60  ;;  %v1049_v25 = vmul.f32 %v1479_v29, %v1048_v19 }
 0x2f3   : > { %v1050_v39 = vadd.f32 %v1479_v29, %v1049_v25 }
 0x2f5   : > { %v1054_v27 = vsel %vm1053_vm11, %v1479_v29, %v1050_v39 }
 0x2f6   : > { %v1059_v42 = vsel %vm1056_vm12, %v1058_v32, %v1054_v27 }
 0x2f7   : > { %v1060_v11 = vmul.f32 %v1059_v42, %v2113_v23 }
 0x2f9   : > { %1161 = vst.msk [vmem:[%s2176_s23 + $0x48] sm:$0xff] %vm1151_vm6, %v1060_v11 }
 0x2fc   : > { %v892_v62 = vpop.xlane.xlu1 %891 }
 0x2fd   : > { %1480 = vrcp.f32 %v892_v62  ;;  %v1010_v57 = vand.u32 2147483647, %v892_v62  ;;  %v1012_v48 = vand.u32 2147483648, %v892_v62  ;;  %vm1006_vm13 = vweird.f32 %v892_v62 }
 0x2ff   : > { %vm2222_vm14 = vcmp.eq.f32.partialorder %v1010_v57, 8.507059e+37  ;;  %v1013_v56 = vor.u32 1.1754944e-38, %v1012_v48 }
 0x300   : > { %v896_v52 = vpop.xlane.xlu0 %895 }
 0x301   : > { %1482 = vrcp.f32 %v896_v52  ;;  %v1040_v45 = vand.u32 2147483647, %v896_v52  ;;  %v1042_v41 = vand.u32 2147483648, %v896_v52  ;;  %vm1036_vm0 = vweird.f32 %v896_v52 }
 0x302   : > { %v900_v43 = vpop.xlane.xlu2 %899 }
 0x303   : > { %v1481_v16 = vpop.eup %1480  ;;  %1484 = vrcp.f32 %v900_v43  ;;  %vm2228_vm2 = vcmp.eq.f32.partialorder %v1040_v45, 8.507059e+37  ;;  %v1043_v31 = vor.u32 1.1754944e-38, %v1042_v41  ;;  %vm1066_vm3 = vweird.f32 %v900_v43 }
 0x304   : > { %v1002_v35 = vmul.f32 %v1481_v16, %v892_v62  ;;  %v2219_v3 = vpop.xlane.xlu1 %885  ;;  %vm1007_vm15 = vweird.f32 %v1481_v16  ;;  %v1070_v55 = vand.u32 2147483647, %v900_v43  ;;  %v1072_v47 = vand.u32 2147483648, %v900_v43 }
 0x305   : > { %1486 = vrcp.f32 %v2219_v3  ;;  %vm1008_vm4 = vmor %vm1006_vm13, %vm1007_vm15  ;;  %v965_v59 = vand.u32 2147483647, %v2219_v3  ;;  %v967_v0 = vand.u32 2147483648, %v2219_v3  ;;  %vm961_vm10 = vweird.f32 %v2219_v3 }
 0x306   : > { %v1003_v34 = vsub.f32 1.0, %v1002_v35  ;;  %vm2245_vm9 = vcmp.eq.f32.partialorder %v1070_v55, 8.507059e+37  ;;  %v1073_v8 = vor.u32 1.1754944e-38, %v1072_v47 }
 0x307   : > { %v1483_v23 = vpop.eup %1482  ;;  %vm2259_vm13 = vcmp.eq.f32.partialorder %v965_v59, 8.507059e+37  ;;  %v968_v25 = vor.u32 1.1754944e-38, %v967_v0 }
 0x308   : > { %v1004_v22 = vmul.f32 %v1481_v16, %v1003_v34  ;;  %v1032_v18 = vmul.f32 %v1483_v23, %v896_v52  ;;  %v2226_v17 = vpop.xlane.xlu0 %889  ;;  %vm1037_vm5 = vweird.f32 %v1483_v23 }
 0x309   : > { %v1485_v10 = vpop.eup %1484  ;;  %1488 = vrcp.f32 %v2226_v17  ;;  %vm1038_vm8 = vmor %vm1036_vm0, %vm1037_vm5  ;;  %v995_v46 = vand.u32 2147483647, %v2226_v17  ;;  %v997_v52 = vand.u32 2147483648, %v2226_v17  ;;  %vm991_vm0 = vweird.f32 %v2226_v17 }
 0x30a   : > { %v1005_v1 = vadd.f32 %v1481_v16, %v1004_v22  ;;  %v1033_v58 = vsub.f32 1.0, %v1032_v18  ;;  %v1062_v54 = vmul.f32 %v1485_v10, %v900_v43  ;;  %v2235_v61 = vpop.xlane.xlu2 %893  ;;  %vm1067_vm7 = vweird.f32 %v1485_v10 }
 0x30b   : > { %v1487_v30 = vpop.eup %1486  ;;  %1490 = vrcp.f32 %v2235_v61  ;;  %vm1068_vm12 = vmor %vm1066_vm3, %vm1067_vm7  ;;  %vm996_vm3 = vcmp.eq.f32.partialorder %v995_v46, 8.507059e+37  ;;  %v1027_v34 = vand.u32 2147483648, %v2235_v61  ;;  %v1025_v22 = vand.u32 2147483647, %v2235_v61 }
 0x30c   : > { %v1009_v6 = vsel %vm1008_vm4, %v1481_v16, %v1005_v1  ;;  %v1034_v7 = vmul.f32 %v1483_v23, %v1033_v58  ;;  %v1063_v4 = vsub.f32 1.0, %v1062_v54  ;;  %v957_v14 = vmul.f32 %v1487_v30, %v2219_v3 }
 0x30d   : > { %v1014_v26 = vsel %vm2222_vm14, %v1013_v56, %v1009_v6  ;;  %vm962_vm11 = vweird.f32 %v1487_v30  ;;  %vm1021_vm5 = vweird.f32 %v2235_v61 }
 0x30e   : > { %v1015_v50 = vmul.f32 %v1014_v26, %v2124_v28  ;;  %v1035_v36 = vadd.f32 %v1483_v23, %v1034_v7  ;;  %v1064_v15 = vmul.f32 %v1485_v10, %v1063_v4  ;;  %v958_v20 = vsub.f32 1.0, %v957_v14  ;;  %vm963_vm14 = vmor %vm961_vm10, %vm962_vm11 }
 0x30f   : > { %v1489_v13 = vpop.eup %1488 }
 0x310   : > { %1158 = vst.msk [vmem:[%s2176_s23 + $0x30] sm:$0xff] %vm1151_vm6, %v1015_v50  ;;  %v1039_v37 = vsel %vm1038_vm8, %v1483_v23, %v1035_v36  ;;  %v1065_v33 = vadd.f32 %v1485_v10, %v1064_v15  ;;  %v959_v28 = vmul.f32 %v1487_v30, %v958_v20  ;;  %v987_v2 = vmul.f32 %v1489_v13, %v2226_v17  ;;  %v2253_v60 = vpop.xlane.xlu0 %883 }
 0x311   : > { %v1044_v19 = vsel %vm2228_vm2, %v1043_v31, %v1039_v37  ;;  %v1491_v11 = vpop.eup %1490  ;;  %vm992_vm15 = vweird.f32 %v1489_v13  ;;  %1492 = vrcp.f32 %v2253_v60  ;;  %v1028_v31 = vor.u32 1.1754944e-38, %v1027_v34 }
 0x312   : > { %v1045_v39 = vmul.f32 %v1044_v19, %v2131_v21  ;;  %v1069_v32 = vsel %vm1068_vm12, %v1485_v10, %v1065_v33  ;;  %v960_v27 = vadd.f32 %v1487_v30, %v959_v28  ;;  %v988_v42 = vsub.f32 1.0, %v987_v2  ;;  %v1211_v43 = vpop.permute.xlu2 %1210  ;;  %vm993_vm2 = vmor %vm991_vm0, %vm992_vm15 }
 0x313   : > { %v1074_v62 = vsel %vm2245_vm9, %v1073_v8, %v1069_v32  ;;  %v1017_v35 = vmul.f32 %v1491_v11, %v2235_v61  ;;  %1246 = vst.msk [vmem:[%s2012_s19 + $0x68] sm:$0xff] %vm1232_vm1, %v1211_v43  ;;  %vm1022_vm4 = vweird.f32 %v1491_v11  ;;  %vm1026_vm8 = vcmp.eq.f32.partialorder %v1025_v22, 8.507059e+37 }
 0x314   : > { %1160 = vst.msk [vmem:[%s2176_s23 + $0x40] sm:$0xff] %vm1151_vm6, %v1045_v39  ;;  %v1075_v21 = vmul.f32 %v1074_v62, %v2136_v44  ;;  %v964_v16 = vsel %vm963_vm14, %v1487_v30, %v960_v27  ;;  %v989_v57 = vmul.f32 %v1489_v13, %v988_v42  ;;  %v998_v44 = vor.u32 1.1754944e-38, %v997_v52  ;;  %vm1023_vm7 = vmor %vm1021_vm5, %vm1022_vm4 }
 0x315   : > { %v969_v48 = vsel %vm2259_vm13, %v968_v25, %v964_v16  ;;  %v1018_v41 = vsub.f32 1.0, %v1017_v35  ;;  %v952_v30 = vand.u32 2147483648, %v2253_v60  ;;  %vm946_vm10 = vweird.f32 %v2253_v60 }
 0x316   : > { %1162 = vst.msk [vmem:[%s2176_s23 + $0x50] sm:$0xff] %vm1151_vm6, %v1075_v21  ;;  %v970_v3 = vmul.f32 %v969_v48, %v2143_v12  ;;  %v990_v45 = vadd.f32 %v1489_v13, %v989_v57 }
 0x317   : > { %v1019_v38 = vmul.f32 %v1491_v11, %v1018_v41  ;;  %v1493_v12 = vpop.eup %1492  ;;  %v953_v4 = vor.u32 1.1754944e-38, %v952_v30 }
 0x318   : > { %1155 = vst.msk [vmem:[%s2176_s23 + $0x18] sm:$0xff] %vm1151_vm6, %v970_v3  ;;  %v994_v23 = vsel %vm993_vm2, %v1489_v13, %v990_v45  ;;  %v908_v56 = vpop.xlane.xlu0 %907  ;;  %v942_v51 = vmul.f32 %v1493_v12, %v2253_v60  ;;  %vm947_vm9 = vweird.f32 %v1493_v12 }
 0x319   : > { %v999_v18 = vsel %vm996_vm3, %v998_v44, %v994_v23  ;;  %1494 = vrcp.f32 %v908_v56  ;;  %v1020_v10 = vadd.f32 %v1491_v11, %v1019_v38  ;;  %vm948_vm11 = vmor %vm946_vm10, %vm947_vm9  ;;  %v1132_v0 = vand.u32 2147483648, %v908_v56 }
 0x31a   : > { %v1000_v17 = vmul.f32 %v999_v18, %v2150_v40  ;;  %v943_v58 = vsub.f32 1.0, %v942_v51  ;;  %v950_v40 = vand.u32 2147483647, %v2253_v60  ;;  %v1130_v15 = vand.u32 2147483647, %v908_v56 }
 0x31b   : > { %v1024_v1 = vsel %vm1023_vm7, %v1491_v11, %v1020_v10  ;;  %vm1126_vm14 = vweird.f32 %v908_v56  ;;  %v1133_v29 = vor.u32 1.1754944e-38, %v1132_v0 }
 0x31c   : > { %1157 = vst.msk [vmem:[%s2176_s23 + $0x28] sm:$0xff] %vm1151_vm6, %v1000_v17  ;;  %v1029_v54 = vsel %vm1026_vm8, %v1028_v31, %v1024_v1  ;;  %v944_v47 = vmul.f32 %v1493_v12, %v943_v58  ;;  %vm951_vm12 = vcmp.eq.f32.partialorder %v950_v40, 8.507059e+37  ;;  %vm1131_vm0 = vcmp.eq.f32.partialorder %v1130_v15, 8.507059e+37 }
 0x31d   : > { %v1030_v55 = vmul.f32 %v1029_v54, %v2155_v53 }
 0x31e   : > { %v945_v61 = vadd.f32 %v1493_v12, %v944_v47 }
 0x31f   : > { %v1495_v59 = vpop.eup %1494  ;;  %1159 = vst.msk [vmem:[%s2176_s23 + $0x38] sm:$0xff] %vm1151_vm6, %v1030_v55 }
 0x320   : > { %v1122_v6 = vmul.f32 %v1495_v59, %v908_v56  ;;  %v902_v7 = vpop.xlane.xlu0 %901  ;;  %v949_v14 = vsel %vm948_vm11, %v1493_v12, %v945_v61  ;;  %vm1127_vm13 = vweird.f32 %v1495_v59 }
 0x321   : > { %1496 = vrcp.f32 %v902_v7  ;;  %v954_v53 = vsel %vm951_vm12, %v953_v4, %v949_v14  ;;  %vm1128_vm15 = vmor %vm1126_vm14, %vm1127_vm13  ;;  %v1085_v19 = vand.u32 2147483647, %v902_v7  ;;  %vm1081_vm3 = vweird.f32 %v902_v7 }
 0x322   : > { %v1123_v26 = vsub.f32 1.0, %v1122_v6  ;;  %v955_v50 = vmul.f32 %v954_v53, %v2162_v63  ;;  %v1087_v63 = vand.u32 2147483648, %v902_v7 }
 0x323   : > { %vm1086_vm5 = vcmp.eq.f32.partialorder %v1085_v19, 8.507059e+37 }
 0x324   : > { %v1124_v36 = vmul.f32 %v1495_v59, %v1123_v26  ;;  %1154 = vst.msk [vmem:[%s2176_s23 + $0x10] sm:$0xff] %vm1151_vm6, %v955_v50  ;;  %v1088_v25 = vor.u32 1.1754944e-38, %v1087_v63 }
 0x326   : > { %v1125_v20 = vadd.f32 %v1495_v59, %v1124_v36 }
 0x327   : > { %v1497_v13 = vpop.eup %1496 }
 0x328   : > { %v1129_v8 = vsel %vm1128_vm15, %v1495_v59, %v1125_v20  ;;  %v1077_v37 = vmul.f32 %v1497_v13, %v902_v7  ;;  %vm1082_vm2 = vweird.f32 %v1497_v13 }
 0x329   : > { %v1134_v33 = vsel %vm1131_vm0, %v1133_v29, %v1129_v8  ;;  %vm1083_vm4 = vmor %vm1081_vm3, %vm1082_vm2 }
 0x32a   : > { %v1135_v28 = vmul.f32 %v1134_v33, %v2169_v9  ;;  %v1078_v2 = vsub.f32 1.0, %v1077_v37 }
 0x32c   : > { %1166 = vst.msk [vmem:[%s2176_s23 + $0x70] sm:$0xff] %vm1151_vm6, %v1135_v28  ;;  %v1079_v60 = vmul.f32 %v1497_v13, %v1078_v2 }
 0x32e   : > { %v1080_v24 = vadd.f32 %v1497_v13, %v1079_v60 }
 0x330   : > { %v1084_v46 = vsel %vm1083_vm4, %v1497_v13, %v1080_v24 }
 0x331   : > { %v1089_v39 = vsel %vm1086_vm5, %v1088_v25, %v1084_v46 }
 0x332   : > { %v1090_v32 = vmul.f32 %v1089_v39, %v2185_v49 }
 0x333   : > { %v1215_v27 = vpop.permute.xlu0 %1214 }
 0x334   : > { %1163 = vst.msk [vmem:[%s2176_s23 + $0x58] sm:$0xff] %vm1151_vm6, %v1090_v32 }
 0x335   : > { %1248 = vst.msk [vmem:[%s2012_s19 + $0x78] sm:$0xff] %vm1232_vm1, %v1215_v27 }
 0x33a   : > { %v910_v9 = vpop.xlane.xlu1 %909 }
 0x33b   : > { %1498 = vrcp.f32 %v910_v9  ;;  %v1147_v52 = vand.u32 2147483648, %v910_v9  ;;  %v1145_v21 = vand.u32 2147483647, %v910_v9  ;;  %vm1141_vm8 = vweird.f32 %v910_v9 }
 0x33d   : > { %v1148_v49 = vor.u32 1.1754944e-38, %v1147_v52  ;;  %vm1146_vm10 = vcmp.eq.f32.partialorder %v1145_v21, 8.507059e+37 }
 0x341   : > { %v1499_v42 = vpop.eup %1498 }
 0x342   : > { %v1137_v11 = vmul.f32 %v1499_v42, %v910_v9  ;;  %vm1142_vm7 = vweird.f32 %v1499_v42 }
 0x343   : > { %vm1143_vm9 = vmor %vm1141_vm8, %vm1142_vm7 }
 0x344   : > { %v1138_v62 = vsub.f32 1.0, %v1137_v11 }
 0x346   : > { %v1139_v43 = vmul.f32 %v1499_v42, %v1138_v62 }
 0x348   : > { %v1140_v16 = vadd.f32 %v1499_v42, %v1139_v43 }
 0x34a   : > { %v1144_v57 = vsel %vm1143_vm9, %v1499_v42, %v1140_v16 }
 0x34b   : > { %v1149_v35 = vsel %vm1146_vm10, %v1148_v49, %v1144_v57 }
 0x34c   : > { %v1150_v48 = vmul.f32 %v1149_v35, %v2198_v5 }
 0x34e   : > { %1167 = vst.msk [vmem:[%s2176_s23 + $0x78] sm:$0xff] %vm1151_vm6, %v1150_v48 }
 0x352   : > { %v1213_v3 = vpop.permute.xlu1 %1212 }
 0x353   : > { %1247 = vst.msk [vmem:[%s2012_s19 + $0x70] sm:$0xff] %vm1232_vm1, %v1213_v3 }
 0x354 PF: > { %s16_s18 = sadd.s32 1, %s1506_s18  }
 0x355   : > { %p13_p4 = scmp.ge.s32.totalorder %s16_s18, 4  }
 0x357   :  { %15 = sbr.rel (!%p13_p4) target bundleno = 1 (0x1), region = 78 }

</bundles_post_ra>
